<compile_context>
chip_gen: v5e
topology: v5e:2x2
jax: 0.10.0
libtpu: 0.0.40
codegen_flags: <defaults>
</compile_context>

<pallas_src>
import math

import jax
import jax.numpy as jnp
from jax.experimental import pallas as pl
from jax.experimental.pallas import tpu as pltpu


NEG_SLOPE = 0.01   # PyTorch nn.LeakyReLU default
PAD = 256          # padded feature width (multiple of 128, MXU-native on v6e+)
N_W = 11           # enc0..enc4, mdl0f, mdl0a, mdl1..mdl4
N_B_ROWS = 16      # 10 biases, padded to a sublane multiple


def _leaky(y):
    return jnp.where(y > 0, y, NEG_SLOPE * y)


def _round_up(x, m):
    return ((x + m - 1) // m) * m


# ----------------------------------------------------------------------------
# Fused kernel: encoder (5 Linear + LeakyReLU) -> "concat" -> model (5 Linear)
# ----------------------------------------------------------------------------
def _fused_forward_kernel(state_ref, action_ref, w_ref, b_ref, out_ref):
    def dot_w(x_f32, wi):
        # bf16 x bf16 -> f32 accumulation on the MXU.
        return jnp.dot(x_f32.astype(jnp.bfloat16), w_ref[wi],
                       preferred_element_type=jnp.float32)

    def bias(bi):
        return b_ref[pl.ds(bi, 1), :]          # (1, PAD) f32, broadcasts

    # ---- encoder(state): LeakyReLU after every layer except the last ----
    x = state_ref[...]                          # (TB, PAD) f32, padded cols = 0
    for i in range(5):
        y = dot_w(x, i) + bias(i)
        x = _leaky(y) if i < 4 else y
    # .detach() in the reference is a forward no-op.

    # ---- model(concat([f, action])) without materializing the concat ----
    a = action_ref[...]                         # (TB, PAD) f32
    y = dot_w(x, 5) + dot_w(a, 6) + bias(5)     # f @ W0f + a @ W0a + b0
    x = _leaky(y)

    for i in range(1, 5):                       # model layers 1..4
        y = dot_w(x, 6 + i) + bias(5 + i)
        x = _leaky(y) if i < 4 else y

    out_ref[...] = x.astype(out_ref.dtype)      # lane-dense padded store


# ----------------------------------------------------------------------------
# Wrapper: one pallas_call, batch grid, weights resident in VMEM
# ----------------------------------------------------------------------------
def forward_model(state, action, w_slab, b_slab):
    """state: (B, input_shape) f32, action: (B, action_dim) f32.

    w_slab: (N_W, PAD, PAD) bf16 packed/transposed weights.
    b_slab: (N_B_ROWS, PAD) f32 packed biases.
    Returns predicted_state: (B, action_dim) f32.
    """
    B, in_dim = state.shape
    action_dim = action.shape[1]

    # Batch tile: multiple of 8 (f32 sublane), capped so VMEM stays tiny even
    # against v7x's 64 MiB (double-buffered (TB, 256) f32 tiles ~< 1.5 MiB).
    TB = 256 if B >= 256 else _round_up(B, 8)
    B_pad = _round_up(B, TB)

    state_p = jnp.pad(state, ((0, B_pad - B), (0, PAD - in_dim)))
    action_p = jnp.pad(action, ((0, B_pad - B), (0, PAD - action_dim)))

    grid = (B_pad // TB,)

    out_p = pl.pallas_call(
        _fused_forward_kernel,
        out_shape=jax.ShapeDtypeStruct((B_pad, PAD), jnp.float32),
        grid=grid,
        in_specs=[
            pl.BlockSpec((TB, PAD), lambda i: (i, 0)),        # state tile
            pl.BlockSpec((TB, PAD), lambda i: (i, 0)),        # action tile
            pl.BlockSpec((N_W, PAD, PAD), lambda i: (0, 0, 0)),   # weights
            pl.BlockSpec((N_B_ROWS, PAD), lambda i: (0, 0)),      # biases
        ],
        out_specs=pl.BlockSpec((TB, PAD), lambda i: (i, 0)),
        compiler_params=pltpu.CompilerParams(
            dimension_semantics=("parallel",)),
    )(state_p, action_p, w_slab, b_slab)

    return out_p[:B, :action_dim]


# ----------------------------------------------------------------------------
# Deterministic parameter init (mirrors PyTorch _robotic_arch shapes/inits)
# and packing into the two VMEM slabs.
# ----------------------------------------------------------------------------
def _xavier_uniform(key, out_f, in_f):
    bound = math.sqrt(6.0 / (in_f + out_f))
    return jax.random.uniform(key, (out_f, in_f), jnp.float32, -bound, bound)


def _uniform_weight(key, out_f, in_f, lo, hi):
    return jax.random.uniform(key, (out_f, in_f), jnp.float32, lo, hi)


def _default_bias(key, out_f, in_f):
    # PyTorch nn.Linear default bias init: U(-1/sqrt(fan_in), 1/sqrt(fan_in))
    bound = 1.0 / math.sqrt(in_f)
    return jax.random.uniform(key, (out_f,), jnp.float32, -bound, bound)


def _pad_weight(w_t):
    """(din, dout) -> (PAD, PAD), zero-padded."""
    din, dout = w_t.shape
    return jnp.zeros((PAD, PAD), jnp.float32).at[:din, :dout].set(w_t)


def _pad_bias(b):
    (dout,) = b.shape
    return jnp.zeros((PAD,), jnp.float32).at[:dout].set(b)


def init_robotic_params(key, input_shape, action_dim, h1, h2):
    # encoder: in -> 10*in -> 10*in -> 5*in -> 5*in -> action_dim
    enc_dims = [(input_shape, input_shape * 10),
                (input_shape * 10, input_shape * 10),
                (input_shape * 10, input_shape * 5),
                (input_shape * 5, input_shape * 5),
                (input_shape * 5, action_dim)]
    # model: 2*action_dim -> h1 -> h1 -> h2 -> h2 -> action_dim
    mdl_dims = [(2 * action_dim, h1),
                (h1, h1),
                (h1, h2),
                (h2, h2),
                (h2, action_dim)]

    keys = jax.random.split(key, 2 * (len(enc_dims) + len(mdl_dims)))
    k = iter(keys)

    w_list = []   # 11 padded (PAD, PAD) f32 weights (input-major, (in, out))
    b_list = []   # 10 padded (PAD,) f32 biases

    for (din, dout) in enc_dims:
        w = _xavier_uniform(next(k), dout, din)          # (out, in)
        b = _default_bias(next(k), dout, din)
        w_list.append(_pad_weight(w.T))
        b_list.append(_pad_bias(b))

    for i, (din, dout) in enumerate(mdl_dims):
        if i == len(mdl_dims) - 1:
            w = _uniform_weight(next(k), dout, din, -0.3, 0.3)
        else:
            w = _xavier_uniform(next(k), dout, din)
        b = _default_bias(next(k), dout, din)
        w_t = w.T                                        # (in, out)
        if i == 0:
            # Pre-split first model layer for the fused in-kernel "concat":
            # rows [:action_dim] multiply f, rows [action_dim:] multiply a.
            w_list.append(_pad_weight(w_t[:action_dim]))     # idx 5: W0f
            w_list.append(_pad_weight(w_t[action_dim:]))     # idx 6: W0a
        else:
            w_list.append(_pad_weight(w_t))
        b_list.append(_pad_bias(b))

    w_slab = jnp.stack(w_list).astype(jnp.bfloat16)          # (11, PAD, PAD)
    b_slab = jnp.zeros((N_B_ROWS, PAD), jnp.float32)
    b_slab = b_slab.at[:len(b_list)].set(jnp.stack(b_list))  # (16, PAD)
    return w_slab, b_slab


# ----------------------------------------------------------------------------
# Pure-JAX reference (same bf16-weight / f32-accumulate arithmetic)
# ----------------------------------------------------------------------------
def _reference_forward(state, action, w_slab, b_slab, action_dim):
    hi = jax.lax.Precision.HIGHEST
    B, in_dim = state.shape
    sp = jnp.pad(state, ((0, 0), (0, PAD - in_dim)))
    ap = jnp.pad(action, ((0, 0), (0, PAD - action_dim)))

    def dot_w(x, wi):
        return jnp.dot(x.astype(jnp.bfloat16), w_slab[wi], precision=hi,
                       preferred_element_type=jnp.float32)

    x = sp
    for i in range(5):
        y = dot_w(x, i) + b_slab[i]
        x = _leaky(y) if i < 4 else y
    y = dot_w(x, 5) + dot_w(ap, 6) + b_slab[5]
    x = _leaky(y)
    for i in range(1, 5):
        y = dot_w(x, 6 + i) + b_slab[5 + i]
        x = _leaky(y) if i < 4 else y
    return x[:, :action_dim]


if __name__ == "__main__":
    # Small shapes consistent with the robotic arch.
    batch = 8
    input_shape = 16     # state feature dim
    action_dim = 4
    h1, h2 = 32, 32      # config.forward_model_h1 / forward_model_h2

    root = jax.random.PRNGKey(0)
    k_params, k_state, k_action = jax.random.split(root, 3)

    w_slab, b_slab = init_robotic_params(
        k_params, input_shape, action_dim, h1, h2)

    state = jax.random.normal(k_state, (batch, input_shape), jnp.float32)
    action = jax.random.normal(k_action, (batch, action_dim), jnp.float32)

    predicted_state = forward_model(state, action, w_slab, b_slab)
    jax.block_until_ready(predicted_state)

    assert predicted_state.shape == (batch, action_dim)
    assert predicted_state.dtype == jnp.float32

    ref = _reference_forward(state, action, w_slab, b_slab, action_dim)
    assert jnp.allclose(predicted_state, ref, rtol=1e-3, atol=1e-3), (
        "mismatch vs reference")

    print("KERNEL_OK")
</pallas_src>

<mosaic_0001>
module attributes {stable_mosaic.version = 11 : i64} {
  func.func @_fused_forward_kernel(%arg0: i32, %arg1: memref<8x256xf32, #tpu.memory_space<vmem>>, %arg2: memref<8x256xf32, #tpu.memory_space<vmem>>, %arg3: memref<11x256x256xbf16, #tpu.memory_space<vmem>>, %arg4: memref<16x256xf32, #tpu.memory_space<vmem>>, %arg5: memref<8x256xf32, #tpu.memory_space<vmem>>) attributes {dimension_semantics = [#tpu.dimension_semantics<parallel>], iteration_bounds = array<i64: 1>, scalar_prefetch = 0 : i64, scratch_operands = 0 : i64, tpu.core_type = #tpu.core_type<tc>, window_params = [{transform_indices = @transform_0, window_bounds = array<i64: 8, 256>}, {transform_indices = @transform_1, window_bounds = array<i64: 8, 256>}, {pipeline_mode = #tpu.pipeline_mode<synchronous>, transform_indices = @transform_2, window_bounds = array<i64: 11, 256, 256>}, {pipeline_mode = #tpu.pipeline_mode<synchronous>, transform_indices = @transform_3, window_bounds = array<i64: 16, 256>}, {transform_indices = @transform_4, window_bounds = array<i64: 8, 256>}]} {
    %c0 = arith.constant 0 : index
    %c0_0 = arith.constant 0 : index
    %0 = vector.load %arg1[%c0, %c0_0] : memref<8x256xf32, #tpu.memory_space<vmem>>, vector<8x256xf32>
    %1 = arith.truncf %0 : vector<8x256xf32> to vector<8x256xbf16>
    %c0_1 = arith.constant 0 : index
    %c0_2 = arith.constant 0 : index
    %c0_3 = arith.constant 0 : index
    %2 = vector.load %arg3[%c0_1, %c0_2, %c0_3] : memref<11x256x256xbf16, #tpu.memory_space<vmem>>, vector<1x256x256xbf16>
    %3 = vector.shape_cast %2 : vector<1x256x256xbf16> to vector<256x256xbf16>
    %cst = arith.constant dense<0.000000e+00> : vector<8x256xf32>
    %4 = tpu.matmul %1, %3, %cst {dimension_numbers = #tpu.dot_dimension_numbers<[1], [0], [0], [1], [0, 0, 1, 1], [], []>} : vector<8x256xbf16>, vector<256x256xbf16>, vector<8x256xf32> -> vector<8x256xf32>
    %c0_4 = arith.constant 0 : index
    %c0_5 = arith.constant 0 : index
    %5 = vector.load %arg4[%c0_4, %c0_5] : memref<16x256xf32, #tpu.memory_space<vmem>>, vector<1x256xf32>
    %6 = vector.broadcast %5 : vector<1x256xf32> to vector<8x256xf32>
    %7 = arith.addf %4, %6 : vector<8x256xf32>
    %cst_6 = arith.constant 0.000000e+00 : f32
    %8 = vector.broadcast %cst_6 : f32 to vector<8x256xf32>
    %9 = arith.cmpf ogt, %7, %8 : vector<8x256xf32>
    %cst_7 = arith.constant 0.00999999977 : f32
    %10 = vector.broadcast %cst_7 : f32 to vector<8x256xf32>
    %11 = arith.mulf %10, %7 : vector<8x256xf32>
    %12 = arith.select %9, %7, %11 : vector<8x256xi1>, vector<8x256xf32>
    %13 = arith.truncf %12 : vector<8x256xf32> to vector<8x256xbf16>
    %c1 = arith.constant 1 : index
    %c0_8 = arith.constant 0 : index
    %c0_9 = arith.constant 0 : index
    %14 = vector.load %arg3[%c1, %c0_8, %c0_9] : memref<11x256x256xbf16, #tpu.memory_space<vmem>>, vector<1x256x256xbf16>
    %15 = vector.shape_cast %14 : vector<1x256x256xbf16> to vector<256x256xbf16>
    %cst_10 = arith.constant dense<0.000000e+00> : vector<8x256xf32>
    %16 = tpu.matmul %13, %15, %cst_10 {dimension_numbers = #tpu.dot_dimension_numbers<[1], [0], [0], [1], [0, 0, 1, 1], [], []>} : vector<8x256xbf16>, vector<256x256xbf16>, vector<8x256xf32> -> vector<8x256xf32>
    %c1_11 = arith.constant 1 : index
    %c0_12 = arith.constant 0 : index
    %17 = vector.load %arg4[%c1_11, %c0_12] : memref<16x256xf32, #tpu.memory_space<vmem>>, vector<1x256xf32>
    %18 = vector.broadcast %17 : vector<1x256xf32> to vector<8x256xf32>
    %19 = arith.addf %16, %18 : vector<8x256xf32>
    %cst_13 = arith.constant 0.000000e+00 : f32
    %20 = vector.broadcast %cst_13 : f32 to vector<8x256xf32>
    %21 = arith.cmpf ogt, %19, %20 : vector<8x256xf32>
    %cst_14 = arith.constant 0.00999999977 : f32
    %22 = vector.broadcast %cst_14 : f32 to vector<8x256xf32>
    %23 = arith.mulf %22, %19 : vector<8x256xf32>
    %24 = arith.select %21, %19, %23 : vector<8x256xi1>, vector<8x256xf32>
    %25 = arith.truncf %24 : vector<8x256xf32> to vector<8x256xbf16>
    %c2 = arith.constant 2 : index
    %c0_15 = arith.constant 0 : index
    %c0_16 = arith.constant 0 : index
    %26 = vector.load %arg3[%c2, %c0_15, %c0_16] : memref<11x256x256xbf16, #tpu.memory_space<vmem>>, vector<1x256x256xbf16>
    %27 = vector.shape_cast %26 : vector<1x256x256xbf16> to vector<256x256xbf16>
    %cst_17 = arith.constant dense<0.000000e+00> : vector<8x256xf32>
    %28 = tpu.matmul %25, %27, %cst_17 {dimension_numbers = #tpu.dot_dimension_numbers<[1], [0], [0], [1], [0, 0, 1, 1], [], []>} : vector<8x256xbf16>, vector<256x256xbf16>, vector<8x256xf32> -> vector<8x256xf32>
    %c2_18 = arith.constant 2 : index
    %c0_19 = arith.constant 0 : index
    %29 = vector.load %arg4[%c2_18, %c0_19] : memref<16x256xf32, #tpu.memory_space<vmem>>, vector<1x256xf32>
    %30 = vector.broadcast %29 : vector<1x256xf32> to vector<8x256xf32>
    %31 = arith.addf %28, %30 : vector<8x256xf32>
    %cst_20 = arith.constant 0.000000e+00 : f32
    %32 = vector.broadcast %cst_20 : f32 to vector<8x256xf32>
    %33 = arith.cmpf ogt, %31, %32 : vector<8x256xf32>
    %cst_21 = arith.constant 0.00999999977 : f32
    %34 = vector.broadcast %cst_21 : f32 to vector<8x256xf32>
    %35 = arith.mulf %34, %31 : vector<8x256xf32>
    %36 = arith.select %33, %31, %35 : vector<8x256xi1>, vector<8x256xf32>
    %37 = arith.truncf %36 : vector<8x256xf32> to vector<8x256xbf16>
    %c3 = arith.constant 3 : index
    %c0_22 = arith.constant 0 : index
    %c0_23 = arith.constant 0 : index
    %38 = vector.load %arg3[%c3, %c0_22, %c0_23] : memref<11x256x256xbf16, #tpu.memory_space<vmem>>, vector<1x256x256xbf16>
    %39 = vector.shape_cast %38 : vector<1x256x256xbf16> to vector<256x256xbf16>
    %cst_24 = arith.constant dense<0.000000e+00> : vector<8x256xf32>
    %40 = tpu.matmul %37, %39, %cst_24 {dimension_numbers = #tpu.dot_dimension_numbers<[1], [0], [0], [1], [0, 0, 1, 1], [], []>} : vector<8x256xbf16>, vector<256x256xbf16>, vector<8x256xf32> -> vector<8x256xf32>
    %c3_25 = arith.constant 3 : index
    %c0_26 = arith.constant 0 : index
    %41 = vector.load %arg4[%c3_25, %c0_26] : memref<16x256xf32, #tpu.memory_space<vmem>>, vector<1x256xf32>
    %42 = vector.broadcast %41 : vector<1x256xf32> to vector<8x256xf32>
    %43 = arith.addf %40, %42 : vector<8x256xf32>
    %cst_27 = arith.constant 0.000000e+00 : f32
    %44 = vector.broadcast %cst_27 : f32 to vector<8x256xf32>
    %45 = arith.cmpf ogt, %43, %44 : vector<8x256xf32>
    %cst_28 = arith.constant 0.00999999977 : f32
    %46 = vector.broadcast %cst_28 : f32 to vector<8x256xf32>
    %47 = arith.mulf %46, %43 : vector<8x256xf32>
    %48 = arith.select %45, %43, %47 : vector<8x256xi1>, vector<8x256xf32>
    %49 = arith.truncf %48 : vector<8x256xf32> to vector<8x256xbf16>
    %c4 = arith.constant 4 : index
    %c0_29 = arith.constant 0 : index
    %c0_30 = arith.constant 0 : index
    %50 = vector.load %arg3[%c4, %c0_29, %c0_30] : memref<11x256x256xbf16, #tpu.memory_space<vmem>>, vector<1x256x256xbf16>
    %51 = vector.shape_cast %50 : vector<1x256x256xbf16> to vector<256x256xbf16>
    %cst_31 = arith.constant dense<0.000000e+00> : vector<8x256xf32>
    %52 = tpu.matmul %49, %51, %cst_31 {dimension_numbers = #tpu.dot_dimension_numbers<[1], [0], [0], [1], [0, 0, 1, 1], [], []>} : vector<8x256xbf16>, vector<256x256xbf16>, vector<8x256xf32> -> vector<8x256xf32>
    %c4_32 = arith.constant 4 : index
    %c0_33 = arith.constant 0 : index
    %53 = vector.load %arg4[%c4_32, %c0_33] : memref<16x256xf32, #tpu.memory_space<vmem>>, vector<1x256xf32>
    %54 = vector.broadcast %53 : vector<1x256xf32> to vector<8x256xf32>
    %55 = arith.addf %52, %54 : vector<8x256xf32>
    %c0_34 = arith.constant 0 : index
    %c0_35 = arith.constant 0 : index
    %56 = vector.load %arg2[%c0_34, %c0_35] : memref<8x256xf32, #tpu.memory_space<vmem>>, vector<8x256xf32>
    %57 = arith.truncf %55 : vector<8x256xf32> to vector<8x256xbf16>
    %c5 = arith.constant 5 : index
    %c0_36 = arith.constant 0 : index
    %c0_37 = arith.constant 0 : index
    %58 = vector.load %arg3[%c5, %c0_36, %c0_37] : memref<11x256x256xbf16, #tpu.memory_space<vmem>>, vector<1x256x256xbf16>
    %59 = vector.shape_cast %58 : vector<1x256x256xbf16> to vector<256x256xbf16>
    %cst_38 = arith.constant dense<0.000000e+00> : vector<8x256xf32>
    %60 = tpu.matmul %57, %59, %cst_38 {dimension_numbers = #tpu.dot_dimension_numbers<[1], [0], [0], [1], [0, 0, 1, 1], [], []>} : vector<8x256xbf16>, vector<256x256xbf16>, vector<8x256xf32> -> vector<8x256xf32>
    %61 = arith.truncf %56 : vector<8x256xf32> to vector<8x256xbf16>
    %c6 = arith.constant 6 : index
    %c0_39 = arith.constant 0 : index
    %c0_40 = arith.constant 0 : index
    %62 = vector.load %arg3[%c6, %c0_39, %c0_40] : memref<11x256x256xbf16, #tpu.memory_space<vmem>>, vector<1x256x256xbf16>
    %63 = vector.shape_cast %62 : vector<1x256x256xbf16> to vector<256x256xbf16>
    %cst_41 = arith.constant dense<0.000000e+00> : vector<8x256xf32>
    %64 = tpu.matmul %61, %63, %cst_41 {dimension_numbers = #tpu.dot_dimension_numbers<[1], [0], [0], [1], [0, 0, 1, 1], [], []>} : vector<8x256xbf16>, vector<256x256xbf16>, vector<8x256xf32> -> vector<8x256xf32>
    %65 = arith.addf %60, %64 : vector<8x256xf32>
    %c5_42 = arith.constant 5 : index
    %c0_43 = arith.constant 0 : index
    %66 = vector.load %arg4[%c5_42, %c0_43] : memref<16x256xf32, #tpu.memory_space<vmem>>, vector<1x256xf32>
    %67 = vector.broadcast %66 : vector<1x256xf32> to vector<8x256xf32>
    %68 = arith.addf %65, %67 : vector<8x256xf32>
    %cst_44 = arith.constant 0.000000e+00 : f32
    %69 = vector.broadcast %cst_44 : f32 to vector<8x256xf32>
    %70 = arith.cmpf ogt, %68, %69 : vector<8x256xf32>
    %cst_45 = arith.constant 0.00999999977 : f32
    %71 = vector.broadcast %cst_45 : f32 to vector<8x256xf32>
    %72 = arith.mulf %71, %68 : vector<8x256xf32>
    %73 = arith.select %70, %68, %72 : vector<8x256xi1>, vector<8x256xf32>
    %74 = arith.truncf %73 : vector<8x256xf32> to vector<8x256xbf16>
    %c7 = arith.constant 7 : index
    %c0_46 = arith.constant 0 : index
    %c0_47 = arith.constant 0 : index
    %75 = vector.load %arg3[%c7, %c0_46, %c0_47] : memref<11x256x256xbf16, #tpu.memory_space<vmem>>, vector<1x256x256xbf16>
    %76 = vector.shape_cast %75 : vector<1x256x256xbf16> to vector<256x256xbf16>
    %cst_48 = arith.constant dense<0.000000e+00> : vector<8x256xf32>
    %77 = tpu.matmul %74, %76, %cst_48 {dimension_numbers = #tpu.dot_dimension_numbers<[1], [0], [0], [1], [0, 0, 1, 1], [], []>} : vector<8x256xbf16>, vector<256x256xbf16>, vector<8x256xf32> -> vector<8x256xf32>
    %c6_49 = arith.constant 6 : index
    %c0_50 = arith.constant 0 : index
    %78 = vector.load %arg4[%c6_49, %c0_50] : memref<16x256xf32, #tpu.memory_space<vmem>>, vector<1x256xf32>
    %79 = vector.broadcast %78 : vector<1x256xf32> to vector<8x256xf32>
    %80 = arith.addf %77, %79 : vector<8x256xf32>
    %cst_51 = arith.constant 0.000000e+00 : f32
    %81 = vector.broadcast %cst_51 : f32 to vector<8x256xf32>
    %82 = arith.cmpf ogt, %80, %81 : vector<8x256xf32>
    %cst_52 = arith.constant 0.00999999977 : f32
    %83 = vector.broadcast %cst_52 : f32 to vector<8x256xf32>
    %84 = arith.mulf %83, %80 : vector<8x256xf32>
    %85 = arith.select %82, %80, %84 : vector<8x256xi1>, vector<8x256xf32>
    %86 = arith.truncf %85 : vector<8x256xf32> to vector<8x256xbf16>
    %c8 = arith.constant 8 : index
    %c0_53 = arith.constant 0 : index
    %c0_54 = arith.constant 0 : index
    %87 = vector.load %arg3[%c8, %c0_53, %c0_54] : memref<11x256x256xbf16, #tpu.memory_space<vmem>>, vector<1x256x256xbf16>
    %88 = vector.shape_cast %87 : vector<1x256x256xbf16> to vector<256x256xbf16>
    %cst_55 = arith.constant dense<0.000000e+00> : vector<8x256xf32>
    %89 = tpu.matmul %86, %88, %cst_55 {dimension_numbers = #tpu.dot_dimension_numbers<[1], [0], [0], [1], [0, 0, 1, 1], [], []>} : vector<8x256xbf16>, vector<256x256xbf16>, vector<8x256xf32> -> vector<8x256xf32>
    %c7_56 = arith.constant 7 : index
    %c0_57 = arith.constant 0 : index
    %90 = vector.load %arg4[%c7_56, %c0_57] : memref<16x256xf32, #tpu.memory_space<vmem>>, vector<1x256xf32>
    %91 = vector.broadcast %90 : vector<1x256xf32> to vector<8x256xf32>
    %92 = arith.addf %89, %91 : vector<8x256xf32>
    %cst_58 = arith.constant 0.000000e+00 : f32
    %93 = vector.broadcast %cst_58 : f32 to vector<8x256xf32>
    %94 = arith.cmpf ogt, %92, %93 : vector<8x256xf32>
    %cst_59 = arith.constant 0.00999999977 : f32
    %95 = vector.broadcast %cst_59 : f32 to vector<8x256xf32>
    %96 = arith.mulf %95, %92 : vector<8x256xf32>
    %97 = arith.select %94, %92, %96 : vector<8x256xi1>, vector<8x256xf32>
    %98 = arith.truncf %97 : vector<8x256xf32> to vector<8x256xbf16>
    %c9 = arith.constant 9 : index
    %c0_60 = arith.constant 0 : index
    %c0_61 = arith.constant 0 : index
    %99 = vector.load %arg3[%c9, %c0_60, %c0_61] : memref<11x256x256xbf16, #tpu.memory_space<vmem>>, vector<1x256x256xbf16>
    %100 = vector.shape_cast %99 : vector<1x256x256xbf16> to vector<256x256xbf16>
    %cst_62 = arith.constant dense<0.000000e+00> : vector<8x256xf32>
    %101 = tpu.matmul %98, %100, %cst_62 {dimension_numbers = #tpu.dot_dimension_numbers<[1], [0], [0], [1], [0, 0, 1, 1], [], []>} : vector<8x256xbf16>, vector<256x256xbf16>, vector<8x256xf32> -> vector<8x256xf32>
    %c8_63 = arith.constant 8 : index
    %c0_64 = arith.constant 0 : index
    %102 = vector.load %arg4[%c8_63, %c0_64] : memref<16x256xf32, #tpu.memory_space<vmem>>, vector<1x256xf32>
    %103 = vector.broadcast %102 : vector<1x256xf32> to vector<8x256xf32>
    %104 = arith.addf %101, %103 : vector<8x256xf32>
    %cst_65 = arith.constant 0.000000e+00 : f32
    %105 = vector.broadcast %cst_65 : f32 to vector<8x256xf32>
    %106 = arith.cmpf ogt, %104, %105 : vector<8x256xf32>
    %cst_66 = arith.constant 0.00999999977 : f32
    %107 = vector.broadcast %cst_66 : f32 to vector<8x256xf32>
    %108 = arith.mulf %107, %104 : vector<8x256xf32>
    %109 = arith.select %106, %104, %108 : vector<8x256xi1>, vector<8x256xf32>
    %110 = arith.truncf %109 : vector<8x256xf32> to vector<8x256xbf16>
    %c10 = arith.constant 10 : index
    %c0_67 = arith.constant 0 : index
    %c0_68 = arith.constant 0 : index
    %111 = vector.load %arg3[%c10, %c0_67, %c0_68] : memref<11x256x256xbf16, #tpu.memory_space<vmem>>, vector<1x256x256xbf16>
    %112 = vector.shape_cast %111 : vector<1x256x256xbf16> to vector<256x256xbf16>
    %cst_69 = arith.constant dense<0.000000e+00> : vector<8x256xf32>
    %113 = tpu.matmul %110, %112, %cst_69 {dimension_numbers = #tpu.dot_dimension_numbers<[1], [0], [0], [1], [0, 0, 1, 1], [], []>} : vector<8x256xbf16>, vector<256x256xbf16>, vector<8x256xf32> -> vector<8x256xf32>
    %c9_70 = arith.constant 9 : index
    %c0_71 = arith.constant 0 : index
    %114 = vector.load %arg4[%c9_70, %c0_71] : memref<16x256xf32, #tpu.memory_space<vmem>>, vector<1x256xf32>
    %115 = vector.broadcast %114 : vector<1x256xf32> to vector<8x256xf32>
    %116 = arith.addf %113, %115 : vector<8x256xf32>
    %c0_72 = arith.constant 0 : index
    %c0_73 = arith.constant 0 : index
    %117 = vector.load %arg5[%c0_72, %c0_73] : memref<8x256xf32, #tpu.memory_space<vmem>>, vector<8x256xf32>
    tpu.vector_store %arg5[%c0_72, %c0_73], %116 {strides = array<i32>} : memref<8x256xf32, #tpu.memory_space<vmem>>, vector<8x256xf32>,
    return
  }
  func.func @transform_0(%arg0: i32) -> (i32, i32) {
    %c0_i32 = arith.constant 0 : i32
    %c0_i32_0 = arith.constant 0 : i32
    return %arg0, %c0_i32 : i32, i32
  }
  func.func @transform_1(%arg0: i32) -> (i32, i32) {
    %c0_i32 = arith.constant 0 : i32
    %c0_i32_0 = arith.constant 0 : i32
    return %arg0, %c0_i32 : i32, i32
  }
  func.func @transform_2(%arg0: i32) -> (i32, i32, i32) {
    %c0_i32 = arith.constant 0 : i32
    %c0_i32_0 = arith.constant 0 : i32
    %c0_i32_1 = arith.constant 0 : i32
    %c0_i32_2 = arith.constant 0 : i32
    return %c0_i32, %c0_i32_0, %c0_i32_1 : i32, i32, i32
  }
  func.func @transform_3(%arg0: i32) -> (i32, i32) {
    %c0_i32 = arith.constant 0 : i32
    %c0_i32_0 = arith.constant 0 : i32
    %c0_i32_1 = arith.constant 0 : i32
    return %c0_i32, %c0_i32_0 : i32, i32
  }
  func.func @transform_4(%arg0: i32) -> (i32, i32) {
    %c0_i32 = arith.constant 0 : i32
    %c0_i32_0 = arith.constant 0 : i32
    return %arg0, %c0_i32 : i32, i32
  }
}

</mosaic_0001>

<bundles_post_ra>
// kernel: tpu_custom_call.1
= control target key start
LH: loop header
LB: loop body
LE: loop exit
PB: predicated region body
PF: predicated region fallthrough
CT: control target
= control target key end

     0   :  { %9 = vsyncpa [#allocation3], 0  ;;  %s4893_s0 = inlined_call_operand.hbm [shape: f32[8,256], index: 0, kind: input, shape index: {}]   ;;  %s4894_s1 = inlined_call_operand.hbm [shape: f32[8,256], index: 1, kind: input, shape index: {}]   ;;  %s4895_s2 = inlined_call_operand.hbm [shape: bf16[11,256,256], index: 2, kind: input, shape index: {}]   ;;  %s4896_s3 = inlined_call_operand.hbm [shape: f32[16,256], index: 3, kind: input, shape index: {}]   ;;  %s4897_s4 = inlined_call_operand.hbm [shape: f32[8,256], index: 4, kind: output, shape index: {}]  }
   0x1   :  { %10 = vsyncpa [#allocation6], 0 }
   0x2   :  { %11 = vsyncpa [#allocation9], 0  ;;  %s29_s17 = sshll.u32 %s4894_s1, 4  ;;  %s30_s17 = int_to_ptr.hbm [resolvable:$true] %s29_s17 }
   0x3   :  { %12 = vsyncpa [#allocation4], 0  ;;  %s4834_s18 = smov [#allocation5]   ;;  %s18_s22 = sshll.u32 %s4893_s0, 4  ;;  %s19_s22 = int_to_ptr.hbm [resolvable:$true] %s18_s22 }
   0x4   :  { %s31_s19 = sshll.u32 %s4834_s18, 4  ;;  %s4835_s23 = smov [#allocation2]   ;;  %s32_s19 = int_to_ptr.vmem [resolvable:$true] %s31_s19 }
   0x5   :  { %34 = dma.hbm_to_vmem [thread:$0]  %s30_s17, 256, %s32_s19, [#allocation6]  }
   0x6   :  { %s20_s24 = sshll.u32 %s4835_s23, 4  ;;  %s39_s27 = sshll.u32 %s4895_s2, 4  ;;  %s21_s24 = int_to_ptr.vmem [resolvable:$true] %s20_s24  ;;  %s40_s27 = int_to_ptr.hbm [resolvable:$true] %s39_s27 }
   0x7   :  { %23 = dma.hbm_to_vmem [thread:$0]  %s19_s22, 256, %s21_s24, [#allocation3]  }
   0x8   :  { %s4836_s1 = smov [#allocation7]   ;;  %s52_s5 = sshll.u32 %s4896_s3, 4  ;;  %s53_s5 = int_to_ptr.hbm [resolvable:$true] %s52_s5 }
   0x9   :  { %s41_s28 = sshll.u32 %s4836_s1, 4  ;;  %s4837_s6 = smov 128   ;;  %s42_s28 = int_to_ptr.vmem [resolvable:$true] %s41_s28 }
   0xa   :  { %s4838_s0 = smov 8   ;;  %s4839_s7 = smov [#allocation8]  }
   0xb   :  { %47 = dma.hbm_to_vmem [thread:$0]  %s40_s27, 45056, %s42_s28, [#allocation6], %s4837_s6, %s4837_s6, %s4838_s0  }
   0xc   :  { %s54_s8 = sshll.u32 %s4839_s7, 4  ;;  %s4840_s9 = smov 256   ;;  %s55_s8 = int_to_ptr.vmem [resolvable:$true] %s54_s8 }
   0xd   :  { %s4841_s10 = smov 16  }
   0xe   :  { %60 = dma.hbm_to_vmem [thread:$0]  %s53_s5, 512, %s55_s8, [#allocation9], %s4840_s9, %s4840_s9, %s4841_s10  }
   0xf   :  { %4826 = dma.done.wait [#allocation3], 256  }
  0x10   :  { %4827 = vsyncadd [#allocation3], 4294967040 }
  0x11   :  { %4828 = dma.done.wait [#allocation6], 45312  }
  0x12   :  { %4829 = vsyncadd [#allocation6], 4294921984 }
  0x13   :  { %4830 = dma.done.wait [#allocation9], 512  }
  0x14   :  { %4831 = vsyncadd [#allocation9], 4294966784  ;;  %v2995_v0 = vld [vmem:[#allocation7 + $0x70] sm:$0xf]  ;;  %v4360_v1 = vld [vmem:[#allocation7 + $0x74] sm:$0xf0] }
  0x15   :  { %v3059_v2 = vld [vmem:[#allocation7 + $0xf0] sm:$0xf]  ;;  %v2996_v3 = vor.u32 %v4360_v1, %v2995_v0  ;;  %v4376_v4 = vld [vmem:[#allocation7 + $0xf4] sm:$0xf0]  ;;  %v4359_v5 = vld [vmem:[#allocation7 + $0x74] sm:$0xf] }
  0x16   :  { %v2997_v6 = vld [vmem:[#allocation7 + $0x78] sm:$0xf0]  ;;  %v3060_v7 = vor.u32 %v4376_v4, %v3059_v2  ;;  %v4375_v9 = vld [vmem:[#allocation7 + $0xf4] sm:$0xf]  ;;  %v2987_v11 = vld [vmem:[#allocation7 + $0x60] sm:$0xf] }
  0x17   :  { %v3000_v8 = vor.u32 %v4359_v5, %v2997_v6  ;;  %v3061_v10 = vld [vmem:[#allocation7 + $0xf8] sm:$0xf0]  ;;  %279 = vmatpush.bf16.msra.mxu0 %v2996_v3  ;;  %v4358_v13 = vld [vmem:[#allocation7 + $0x64] sm:$0xf0]  ;;  %v3051_v14 = vld [vmem:[#allocation7 + $0xe0] sm:$0xf] }
  0x18   :  { %v3064_v12 = vor.u32 %v4375_v9, %v3061_v10  ;;  %v4374_v15 = vld [vmem:[#allocation7 + $0xe4] sm:$0xf0]  ;;  %292 = vmatpush.bf16.msra.mxu1 %v3060_v7  ;;  %v2988_v16 = vor.u32 %v4358_v13, %v2987_v11  ;;  %v4357_v18 = vld [vmem:[#allocation7 + $0x64] sm:$0xf]  ;;  %v2989_v19 = vld [vmem:[#allocation7 + $0x68] sm:$0xf0] }
  0x19   :  { %305 = vmatpush.bf16.msra.mxu2 %v3000_v8  ;;  %v3052_v17 = vor.u32 %v4374_v15, %v3051_v14  ;;  %v4373_v20 = vld [vmem:[#allocation7 + $0xe4] sm:$0xf]  ;;  %v2992_v21 = vor.u32 %v4357_v18, %v2989_v19  ;;  %v3053_v22 = vld [vmem:[#allocation7 + $0xe8] sm:$0xf0]  ;;  %v2979_v23 = vld [vmem:[#allocation7 + $0x50] sm:$0xf] }
  0x1a   :  { %318 = vmatpush.bf16.msra.mxu3 %v3064_v12  ;;  %v4356_v24 = vld [vmem:[#allocation7 + $0x54] sm:$0xf0]  ;;  %v3056_v25 = vor.u32 %v4373_v20, %v3053_v22  ;;  %v3043_v26 = vld [vmem:[#allocation7 + $0xd0] sm:$0xf]  ;;  %v4355_v28 = vld [vmem:[#allocation7 + $0x54] sm:$0xf] }
  0x1b   :  { %v4372_v27 = vld [vmem:[#allocation7 + $0xd4] sm:$0xf0]  ;;  %280 = vmatpush.bf16.msra.mxu0 %v2988_v16  ;;  %v2980_v29 = vor.u32 %v4356_v24, %v2979_v23  ;;  %v2981_v30 = vld [vmem:[#allocation7 + $0x58] sm:$0xf0]  ;;  %v4371_v31 = vld [vmem:[#allocation7 + $0xd4] sm:$0xf] }
  0x1c   :  { %v3045_v32 = vld [vmem:[#allocation7 + $0xd8] sm:$0xf0]  ;;  %293 = vmatpush.bf16.msra.mxu1 %v3052_v17  ;;  %v3044_v33 = vor.u32 %v4372_v27, %v3043_v26  ;;  %v2984_v34 = vor.u32 %v4355_v28, %v2981_v30  ;;  %v2971_v35 = vld [vmem:[#allocation7 + $0x40] sm:$0xf]  ;;  %v4354_v36 = vld [vmem:[#allocation7 + $0x44] sm:$0xf0] }
  0x1d   :  { %306 = vmatpush.bf16.msra.mxu2 %v2992_v21  ;;  %v3035_v37 = vld [vmem:[#allocation7 + $0xc0] sm:$0xf]  ;;  %v3048_v38 = vor.u32 %v4371_v31, %v3045_v32  ;;  %v4370_v39 = vld [vmem:[#allocation7 + $0xc4] sm:$0xf0]  ;;  %v4353_v40 = vld [vmem:[#allocation7 + $0x44] sm:$0xf]  ;;  %v2972_v44 = vor.u32 %v4354_v36, %v2971_v35 }
  0x1e   :  { %319 = vmatpush.bf16.msra.mxu3 %v3056_v25  ;;  %v2973_v41 = vld [vmem:[#allocation7 + $0x48] sm:$0xf0]  ;;  %v4369_v42 = vld [vmem:[#allocation7 + $0xc4] sm:$0xf]  ;;  %v3036_v45 = vor.u32 %v4370_v39, %v3035_v37  ;;  %v2963_v47 = vld [vmem:[#allocation7 + $0x30] sm:$0xf] }
  0x1f   :  { %v3037_v43 = vld [vmem:[#allocation7 + $0xc8] sm:$0xf0]  ;;  %281 = vmatpush.bf16.msra.mxu0 %v2980_v29  ;;  %v2976_v46 = vor.u32 %v4353_v40, %v2973_v41  ;;  %v4352_v48 = vld [vmem:[#allocation7 + $0x34] sm:$0xf0]  ;;  %v3027_v49 = vld [vmem:[#allocation7 + $0xb0] sm:$0xf] }
  0x20   :  { %294 = vmatpush.bf16.msra.mxu1 %v3044_v33  ;;  %v3040_v50 = vor.u32 %v4369_v42, %v3037_v43  ;;  %v4368_v51 = vld [vmem:[#allocation7 + $0xb4] sm:$0xf0]  ;;  %v4351_v52 = vld [vmem:[#allocation7 + $0x34] sm:$0xf]  ;;  %v2965_v53 = vld [vmem:[#allocation7 + $0x38] sm:$0xf0]  ;;  %v2964_v56 = vor.u32 %v4352_v48, %v2963_v47 }
  0x21   :  { %307 = vmatpush.bf16.msra.mxu2 %v2984_v34  ;;  %v4367_v54 = vld [vmem:[#allocation7 + $0xb4] sm:$0xf]  ;;  %v3029_v55 = vld [vmem:[#allocation7 + $0xb8] sm:$0xf0]  ;;  %v3028_v57 = vor.u32 %v4368_v51, %v3027_v49  ;;  %v2968_v58 = vor.u32 %v4351_v52, %v2965_v53  ;;  %v2955_v59 = vld [vmem:[#allocation7 + $0x20] sm:$0xf] }
  0x22   :  { %320 = vmatpush.bf16.msra.mxu3 %v3048_v38  ;;  %v4350_v60 = vld [vmem:[#allocation7 + $0x24] sm:$0xf0]  ;;  %v3019_v61 = vld [vmem:[#allocation7 + $0xa0] sm:$0xf]  ;;  %v3032_v62 = vor.u32 %v4367_v54, %v3029_v55  ;;  %v4349_v0 = vld [vmem:[#allocation7 + $0x24] sm:$0xf] }
  0x23   :  { %282 = vmatpush.bf16.msra.mxu0 %v2972_v44  ;;  %v4366_v63 = vld [vmem:[#allocation7 + $0xa4] sm:$0xf0]  ;;  %v2957_v1 = vld [vmem:[#allocation7 + $0x28] sm:$0xf0]  ;;  %v4365_v2 = vld [vmem:[#allocation7 + $0xa4] sm:$0xf]  ;;  %v2956_v4 = vor.u32 %v4350_v60, %v2955_v59 }
  0x24   :  { %295 = vmatpush.bf16.msra.mxu1 %v3036_v45  ;;  %v3021_v3 = vld [vmem:[#allocation7 + $0xa8] sm:$0xf0]  ;;  %v3020_v5 = vor.u32 %v4366_v63, %v3019_v61  ;;  %v2960_v6 = vor.u32 %v4349_v0, %v2957_v1  ;;  %v2947_v7 = vld [vmem:[#allocation7 + $0x10] sm:$0xf]  ;;  %v4348_v8 = vld [vmem:[#allocation7 + $0x14] sm:$0xf0] }
  0x25   :  { %308 = vmatpush.bf16.msra.mxu2 %v2976_v46  ;;  %v3011_v9 = vld [vmem:[#allocation7 + $0x90] sm:$0xf]  ;;  %v3024_v10 = vor.u32 %v4365_v2, %v3021_v3  ;;  %v4364_v11 = vld [vmem:[#allocation7 + $0x94] sm:$0xf0]  ;;  %v4347_v12 = vld [vmem:[#allocation7 + $0x14] sm:$0xf]  ;;  %v2948_v16 = vor.u32 %v4348_v8, %v2947_v7 }
  0x26   :  { %321 = vmatpush.bf16.msra.mxu3 %v3040_v50  ;;  %v2949_v13 = vld [vmem:[#allocation7 + $0x18] sm:$0xf0]  ;;  %v4363_v14 = vld [vmem:[#allocation7 + $0x94] sm:$0xf]  ;;  %v2939_v17 = vld [vmem:[#allocation7] sm:$0xf]  ;;  %v3012_v18 = vor.u32 %v4364_v11, %v3011_v9 }
  0x27   :  { %283 = vmatpush.bf16.msra.mxu0 %v2964_v56  ;;  %v3013_v15 = vld [vmem:[#allocation7 + $0x98] sm:$0xf0]  ;;  %v2952_v19 = vor.u32 %v4347_v12, %v2949_v13  ;;  %v4346_v20 = vld [vmem:[#allocation7 + $0x4] sm:$0xf0]  ;;  %v3003_v21 = vld [vmem:[#allocation7 + $0x80] sm:$0xf] }
  0x28   :  { %296 = vmatpush.bf16.msra.mxu1 %v3028_v57  ;;  %v4362_v22 = vld [vmem:[#allocation7 + $0x84] sm:$0xf0]  ;;  %v3016_v23 = vor.u32 %v4363_v14, %v3013_v15  ;;  %v4345_v24 = vld [vmem:[#allocation7 + $0x4] sm:$0xf]  ;;  %v2941_v25 = vld [vmem:[#allocation7 + $0x8] sm:$0xf0]  ;;  %v2940_v30 = vor.u32 %v4346_v20, %v2939_v17 }
  0x29   :  { %309 = vmatpush.bf16.msra.mxu2 %v2968_v58  ;;  %v4361_v26 = vld [vmem:[#allocation7 + $0x84] sm:$0xf]  ;;  %v3005_v27 = vld [vmem:[#allocation7 + $0x88] sm:$0xf0]  ;;  %v3123_v28 = vld [vmem:[#allocation7 + $0x170] sm:$0xf]  ;;  %v3004_v34 = vor.u32 %v4362_v22, %v3003_v21  ;;  %v2944_v35 = vor.u32 %v4345_v24, %v2941_v25 }
  0x2a   :  { %322 = vmatpush.bf16.msra.mxu3 %v3032_v62  ;;  %v4392_v29 = vld [vmem:[#allocation7 + $0x174] sm:$0xf0]  ;;  %v77_v31 = vld [vmem:[#allocation2] sm:$0xff]  ;;  %v4391_v32 = vld [vmem:[#allocation7 + $0x174] sm:$0xf]  ;;  %v3008_v37 = vor.u32 %v4361_v26, %v3005_v27  ;;  %s4842_s2 = smov [#allocation10]  }
  0x2b   :  { %284 = vmatpush.bf16.msra.mxu0 %v2956_v4  ;;  %v3125_v33 = vld [vmem:[#allocation7 + $0x178] sm:$0xf0]  ;;  %v78_v36 = vld [vmem:[#allocation2 + $0x8] sm:$0xff]  ;;  %v3124_v38 = vor.u32 %v4392_v29, %v3123_v28  ;;  %v3115_v39 = vld [vmem:[#allocation7 + $0x160] sm:$0xf]  ;;  %v79_v42 = vpack.c.bf16 %v77_v31, %v77_v31  ;;  %s2923_s3 = sshll.u32 %s4842_s2, 4  ;;  %s2924_s3 = int_to_ptr.vmem [resolvable:$true] %s2923_s3 }
  0x2c   :  { %297 = vmatpush.bf16.msra.mxu1 %v3020_v5  ;;  %v3187_v40 = vld [vmem:[#allocation7 + $0x1f0] sm:$0xf]  ;;  %v4408_v41 = vld [vmem:[#allocation7 + $0x1f4] sm:$0xf0]  ;;  %v3128_v43 = vor.u32 %v4391_v32, %v3125_v33  ;;  %v4390_v44 = vld [vmem:[#allocation7 + $0x164] sm:$0xf0]  ;;  %v80_v47 = vpack.c.bf16 %v78_v36, %v78_v36 }
  0x2d   :  { %310 = vmatpush.bf16.msra.mxu2 %v2960_v6  ;;  %v4407_v45 = vld [vmem:[#allocation7 + $0x1f4] sm:$0xf]  ;;  %v3189_v46 = vld [vmem:[#allocation7 + $0x1f8] sm:$0xf0]  ;;  %v4389_v48 = vld [vmem:[#allocation7 + $0x164] sm:$0xf]  ;;  %v3188_v50 = vor.u32 %v4408_v41, %v3187_v40  ;;  %v3116_v51 = vor.u32 %v4390_v44, %v3115_v39 }
  0x2e   :  { %323 = vmatpush.bf16.msra.mxu3 %v3024_v10  ;;  %v3117_v49 = vld [vmem:[#allocation7 + $0x168] sm:$0xf0]  ;;  %v3192_v52 = vor.u32 %v4407_v45, %v3189_v46  ;;  %v3107_v53 = vld [vmem:[#allocation7 + $0x150] sm:$0xf]  ;;  %v3179_v54 = vld [vmem:[#allocation7 + $0x1e0] sm:$0xf] }
  0x2f   :  { %285 = vmatpush.bf16.msra.mxu0 %v2948_v16  ;;  %v4406_v55 = vld [vmem:[#allocation7 + $0x1e4] sm:$0xf0]  ;;  %v3120_v56 = vor.u32 %v4389_v48, %v3117_v49  ;;  %v4388_v57 = vld [vmem:[#allocation7 + $0x154] sm:$0xf0]  ;;  %v4405_v58 = vld [vmem:[#allocation7 + $0x1e4] sm:$0xf] }
  0x30   :  { %298 = vmatpush.bf16.msra.mxu1 %v3012_v18  ;;  %v3181_v59 = vld [vmem:[#allocation7 + $0x1e8] sm:$0xf0]  ;;  %v4387_v60 = vld [vmem:[#allocation7 + $0x154] sm:$0xf]  ;;  %v3109_v61 = vld [vmem:[#allocation7 + $0x158] sm:$0xf0]  ;;  %v3180_v62 = vor.u32 %v4406_v55, %v3179_v54  ;;  %v3108_v63 = vor.u32 %v4388_v57, %v3107_v53 }
  0x31   :  { %311 = vmatpush.bf16.msra.mxu2 %v2952_v19  ;;  %v3184_v0 = vor.u32 %v4405_v58, %v3181_v59  ;;  %v3099_v1 = vld [vmem:[#allocation7 + $0x140] sm:$0xf]  ;;  %v3171_v2 = vld [vmem:[#allocation7 + $0x1d0] sm:$0xf]  ;;  %v4404_v3 = vld [vmem:[#allocation7 + $0x1d4] sm:$0xf0]  ;;  %v3112_v4 = vor.u32 %v4387_v60, %v3109_v61 }
  0x32   :  { %324 = vmatpush.bf16.msra.mxu3 %v3016_v23  ;;  %v4386_v5 = vld [vmem:[#allocation7 + $0x144] sm:$0xf0]  ;;  %v4403_v6 = vld [vmem:[#allocation7 + $0x1d4] sm:$0xf]  ;;  %v3173_v7 = vld [vmem:[#allocation7 + $0x1d8] sm:$0xf0]  ;;  %v3172_v10 = vor.u32 %v4404_v3, %v3171_v2 }
  0x33   :  { %286 = vmatpush.bf16.msra.mxu0 %v2940_v30  ;;  %v4385_v8 = vld [vmem:[#allocation7 + $0x144] sm:$0xf]  ;;  %v3101_v9 = vld [vmem:[#allocation7 + $0x148] sm:$0xf0]  ;;  %v3100_v11 = vor.u32 %v4386_v5, %v3099_v1  ;;  %v3176_v12 = vor.u32 %v4403_v6, %v3173_v7  ;;  %v3091_v13 = vld [vmem:[#allocation7 + $0x130] sm:$0xf] }
  0x34   :  { %299 = vmatpush.bf16.msra.mxu1 %v3004_v34  ;;  %v3163_v14 = vld [vmem:[#allocation7 + $0x1c0] sm:$0xf]  ;;  %v4402_v15 = vld [vmem:[#allocation7 + $0x1c4] sm:$0xf0]  ;;  %v3104_v16 = vor.u32 %v4385_v8, %v3101_v9  ;;  %v4384_v17 = vld [vmem:[#allocation7 + $0x134] sm:$0xf0] }
  0x35   :  { %312 = vmatpush.bf16.msra.mxu2 %v2944_v35  ;;  %v4401_v18 = vld [vmem:[#allocation7 + $0x1c4] sm:$0xf]  ;;  %v3165_v19 = vld [vmem:[#allocation7 + $0x1c8] sm:$0xf0]  ;;  %v4383_v20 = vld [vmem:[#allocation7 + $0x134] sm:$0xf]  ;;  %v3164_v22 = vor.u32 %v4402_v15, %v3163_v14  ;;  %v3092_v23 = vor.u32 %v4384_v17, %v3091_v13 }
  0x36   :  { %325 = vmatpush.bf16.msra.mxu3 %v3008_v37  ;;  %287 = vmatmul.bf16.vlgmr.msra.gmra.mxu0 %v79_v42  ;;  %v3093_v21 = vld [vmem:[#allocation7 + $0x138] sm:$0xf0]  ;;  %v3168_v24 = vor.u32 %v4401_v18, %v3165_v19  ;;  %v3083_v26 = vld [vmem:[#allocation7 + $0x120] sm:$0xf]  ;;  %v4382_v27 = vld [vmem:[#allocation7 + $0x124] sm:$0xf0] }
  0x37   :  { %539 = vmatpush.bf16.msrb.mxu0 %v3124_v38  ;;  %300 = vmatmul.bf16.vlgmr.msra.gmra.mxu1 %v80_v47  ;;  %v3096_v25 = vor.u32 %v4383_v20, %v3093_v21  ;;  %v4381_v28 = vld [vmem:[#allocation7 + $0x124] sm:$0xf]  ;;  %v3085_v29 = vld [vmem:[#allocation7 + $0x128] sm:$0xf0]  ;;  %v3084_v30 = vor.u32 %v4382_v27, %v3083_v26  ;;  %v3155_v32 = vld [vmem:[#allocation7 + $0x1b0] sm:$0xf] }
  0x38   :  { %313 = vmatmul.bf16.vlgmr.msra.gmra.mxu2 %v79_v42  ;;  %552 = vmatpush.bf16.msrb.mxu1 %v3188_v50  ;;  %v3088_v31 = vor.u32 %v4381_v28, %v3085_v29  ;;  %v4400_v33 = vld [vmem:[#allocation7 + $0x1b4] sm:$0xf0]  ;;  %v4399_v34 = vld [vmem:[#allocation7 + $0x1b4] sm:$0xf]  ;;  %v3157_v36 = vld [vmem:[#allocation7 + $0x1b8] sm:$0xf0] }
  0x39   :  { %565 = vmatpush.bf16.msrb.mxu2 %v3128_v43  ;;  %326 = vmatmul.bf16.vlgmr.msra.gmra.mxu3 %v80_v47  ;;  %v3156_v35 = vor.u32 %v4400_v33, %v3155_v32  ;;  %v3160_v37 = vor.u32 %v4399_v34, %v3157_v36  ;;  %v3075_v38 = vld [vmem:[#allocation7 + $0x110] sm:$0xf]  ;;  %v4380_v39 = vld [vmem:[#allocation7 + $0x114] sm:$0xf0]  ;;  %v4379_v40 = vld [vmem:[#allocation7 + $0x114] sm:$0xf] }
  0x3a   :  { %578 = vmatpush.bf16.msrb.mxu3 %v3192_v52  ;;  %v3076_v41 = vor.u32 %v4380_v39, %v3075_v38  ;;  %v3077_v42 = vld [vmem:[#allocation7 + $0x118] sm:$0xf0]  ;;  %v3147_v44 = vld [vmem:[#allocation7 + $0x1a0] sm:$0xf]  ;;  %v4398_v45 = vld [vmem:[#allocation7 + $0x1a4] sm:$0xf0] }
  0x3b   :  { %540 = vmatpush.bf16.msrb.mxu0 %v3116_v51  ;;  %v3080_v43 = vor.u32 %v4379_v40, %v3077_v42  ;;  %v4397_v46 = vld [vmem:[#allocation7 + $0x1a4] sm:$0xf]  ;;  %v3148_v47 = vor.u32 %v4398_v45, %v3147_v44  ;;  %v3149_v48 = vld [vmem:[#allocation7 + $0x1a8] sm:$0xf0]  ;;  %v3067_v50 = vld [vmem:[#allocation7 + $0x100] sm:$0xf] }
  0x3c   :  { %553 = vmatpush.bf16.msrb.mxu1 %v3180_v62  ;;  %v3152_v49 = vor.u32 %v4397_v46, %v3149_v48  ;;  %v4378_v51 = vld [vmem:[#allocation7 + $0x104] sm:$0xf0]  ;;  %v4377_v52 = vld [vmem:[#allocation7 + $0x104] sm:$0xf]  ;;  %v3069_v54 = vld [vmem:[#allocation7 + $0x108] sm:$0xf0] }
  0x3d   :  { %566 = vmatpush.bf16.msrb.mxu2 %v3120_v56  ;;  %v3068_v53 = vor.u32 %v4378_v51, %v3067_v50  ;;  %v3072_v55 = vor.u32 %v4377_v52, %v3069_v54  ;;  %v3139_v56 = vld [vmem:[#allocation7 + $0x190] sm:$0xf]  ;;  %v4396_v57 = vld [vmem:[#allocation7 + $0x194] sm:$0xf0]  ;;  %v4395_v58 = vld [vmem:[#allocation7 + $0x194] sm:$0xf] }
  0x3e   :  { %579 = vmatpush.bf16.msrb.mxu3 %v3184_v0  ;;  %v3140_v59 = vor.u32 %v4396_v57, %v3139_v56  ;;  %v3141_v60 = vld [vmem:[#allocation7 + $0x198] sm:$0xf0]  ;;  %v3131_v62 = vld [vmem:[#allocation7 + $0x180] sm:$0xf]  ;;  %v4393_v0 = vld [vmem:[#allocation7 + $0x184] sm:$0xf] }
  0x3f   :  { %541 = vmatpush.bf16.msrb.mxu0 %v3108_v63  ;;  %v3144_v61 = vor.u32 %v4395_v58, %v3141_v60  ;;  %v4394_v63 = vld [vmem:[#allocation7 + $0x184] sm:$0xf0]  ;;  %v3133_v2 = vld [vmem:[#allocation7 + $0x188] sm:$0xf0]  ;;  %v4424_v5 = vld [vmem:[#allocation7 + $0x274] sm:$0xf0] }
  0x40   :  { %554 = vmatpush.bf16.msrb.mxu1 %v3172_v10  ;;  %v3132_v1 = vor.u32 %v4394_v63, %v3131_v62  ;;  %v3136_v3 = vor.u32 %v4393_v0, %v3133_v2  ;;  %v4423_v6 = vld [vmem:[#allocation7 + $0x274] sm:$0xf]  ;;  %v3253_v8 = vld [vmem:[#allocation7 + $0x278] sm:$0xf0]  ;;  %v3243_v9 = vld [vmem:[#allocation7 + $0x260] sm:$0xf] }
  0x41   :  { %567 = vmatpush.bf16.msrb.mxu2 %v3112_v4  ;;  %v3251_v4 = vld [vmem:[#allocation7 + $0x270] sm:$0xf]  ;;  %v4422_v10 = vld [vmem:[#allocation7 + $0x264] sm:$0xf0]  ;;  %v3245_v13 = vld [vmem:[#allocation7 + $0x268] sm:$0xf0] }
  0x42   :  { %580 = vmatpush.bf16.msrb.mxu3 %v3176_v12  ;;  %v3252_v7 = vor.u32 %v4424_v5, %v3251_v4  ;;  %v4421_v12 = vld [vmem:[#allocation7 + $0x264] sm:$0xf]  ;;  %v3315_v14 = vld [vmem:[#allocation7 + $0x2f0] sm:$0xf]  ;;  %v3244_v15 = vor.u32 %v4422_v10, %v3243_v9  ;;  %v4439_v17 = vld [vmem:[#allocation7 + $0x2f4] sm:$0xf] }
  0x43   :  { %542 = vmatpush.bf16.msrb.mxu0 %v3100_v11  ;;  %v3256_v11 = vor.u32 %v4423_v6, %v3253_v8  ;;  %v3317_v18 = vld [vmem:[#allocation7 + $0x2f8] sm:$0xf0]  ;;  %v3248_v19 = vor.u32 %v4421_v12, %v3245_v13  ;;  %v3307_v26 = vld [vmem:[#allocation7 + $0x2e0] sm:$0xf]  ;;  %v4438_v27 = vld [vmem:[#allocation7 + $0x2e4] sm:$0xf0] }
  0x44   :  { %555 = vmatpush.bf16.msrb.mxu1 %v3164_v22  ;;  %v3320_v21 = vor.u32 %v4439_v17, %v3317_v18  ;;  %v3235_v22 = vld [vmem:[#allocation7 + $0x250] sm:$0xf]  ;;  %v3308_v28 = vor.u32 %v4438_v27, %v3307_v26  ;;  %v4437_v29 = vld [vmem:[#allocation7 + $0x2e4] sm:$0xf]  ;;  %v3227_v34 = vld [vmem:[#allocation7 + $0x240] sm:$0xf] }
  0x45   :  { %568 = vmatpush.bf16.msrb.mxu2 %v3104_v16  ;;  %v4440_v16 = vld [vmem:[#allocation7 + $0x2f4] sm:$0xf0]  ;;  %v4435_v39 = vld [vmem:[#allocation7 + $0x2d4] sm:$0xf]  ;;  %v4417_v40 = vld [vmem:[#allocation7 + $0x244] sm:$0xf] }
  0x46   :  { %581 = vmatpush.bf16.msrb.mxu3 %v3168_v24  ;;  %v3316_v20 = vor.u32 %v4440_v16, %v3315_v14  ;;  %v4419_v24 = vld [vmem:[#allocation7 + $0x254] sm:$0xf]  ;;  %v4436_v38 = vld [vmem:[#allocation7 + $0x2d4] sm:$0xf0]  ;;  %v3301_v42 = vld [vmem:[#allocation7 + $0x2d8] sm:$0xf0] }
  0x47   :  { %543 = vmatpush.bf16.msrb.mxu0 %v3092_v23  ;;  %v4420_v23 = vld [vmem:[#allocation7 + $0x254] sm:$0xf0]  ;;  %v3304_v44 = vor.u32 %v4435_v39, %v3301_v42  ;;  %v3219_v48 = vld [vmem:[#allocation7 + $0x230] sm:$0xf]  ;;  %v4415_v50 = vld [vmem:[#allocation7 + $0x234] sm:$0xf] }
  0x48   :  { %556 = vmatpush.bf16.msrb.mxu1 %v3156_v35  ;;  %v3236_v32 = vor.u32 %v4420_v23, %v3235_v22  ;;  %v4418_v35 = vld [vmem:[#allocation7 + $0x244] sm:$0xf0]  ;;  %v3221_v51 = vld [vmem:[#allocation7 + $0x238] sm:$0xf0]  ;;  %v3291_v9 = vld [vmem:[#allocation7 + $0x2c0] sm:$0xf] }
  0x49   :  { %569 = vmatpush.bf16.msrb.mxu2 %v3096_v25  ;;  %v3237_v25 = vld [vmem:[#allocation7 + $0x258] sm:$0xf0]  ;;  %v3228_v45 = vor.u32 %v4418_v35, %v3227_v34  ;;  %v3224_v56 = vor.u32 %v4415_v50, %v3221_v51  ;;  %v4434_v10 = vld [vmem:[#allocation7 + $0x2c4] sm:$0xf0]  ;;  %v3293_v13 = vld [vmem:[#allocation7 + $0x2c8] sm:$0xf0] }
  0x4a   :  { %582 = vmatpush.bf16.msrb.mxu3 %v3160_v37  ;;  %v3240_v36 = vor.u32 %v4419_v24, %v3237_v25  ;;  %v3299_v37 = vld [vmem:[#allocation7 + $0x2d0] sm:$0xf]  ;;  %v3292_v12 = vor.u32 %v4434_v10, %v3291_v9  ;;  %v3211_v14 = vld [vmem:[#allocation7 + $0x220] sm:$0xf]  ;;  %v4413_v18 = vld [vmem:[#allocation7 + $0x224] sm:$0xf] }
  0x4b   :  { %544 = vmatpush.bf16.msrb.mxu0 %v3084_v30  ;;  %v3309_v30 = vld [vmem:[#allocation7 + $0x2e8] sm:$0xf0]  ;;  %v4432_v22 = vld [vmem:[#allocation7 + $0x2b4] sm:$0xf0]  ;;  %v4431_v23 = vld [vmem:[#allocation7 + $0x2b4] sm:$0xf] }
  0x4c   :  { %557 = vmatpush.bf16.msrb.mxu1 %v3148_v47  ;;  %v3312_v33 = vor.u32 %v4437_v29, %v3309_v30  ;;  %v3285_v24 = vld [vmem:[#allocation7 + $0x2b8] sm:$0xf0]  ;;  %v3203_v27 = vld [vmem:[#allocation7 + $0x210] sm:$0xf]  ;;  %v4411_v29 = vld [vmem:[#allocation7 + $0x214] sm:$0xf] }
  0x4d   :  { %570 = vmatpush.bf16.msrb.mxu2 %v3088_v31  ;;  %v113_v31 = vld [vmem:[#allocation8] ss:$8 sm:$0x3]  ;;  %v3288_v26 = vor.u32 %v4431_v23, %v3285_v24  ;;  %v4429_v35 = vld [vmem:[#allocation7 + $0x2a4] sm:$0xf]  ;;  %s2925_s13 = sshll.u32 %s4897_s4, 4  ;;  %s2926_s13 = int_to_ptr.hbm [resolvable:$true] %s2925_s13 }
  0x4e   :  { %583 = vmatpush.bf16.msrb.mxu3 %v3152_v49  ;;  %v115_v46 = vperm.slane %v113_v31, 0  ;;  %v4416_v49 = vld [vmem:[#allocation7 + $0x234] sm:$0xf0]  ;;  %v116_v58 = vperm.slane %v113_v31, 1  ;;  %v3205_v31 = vld [vmem:[#allocation7 + $0x218] sm:$0xf0] }
  0x4f   :  { %545 = vmatpush.bf16.msrb.mxu0 %v3076_v41  ;;  %v3229_v41 = vld [vmem:[#allocation7 + $0x248] sm:$0xf0]  ;;  %v4430_v34 = vld [vmem:[#allocation7 + $0x2a4] sm:$0xf0]  ;;  %v3195_v39 = vld [vmem:[#allocation7 + $0x200] sm:$0xf] }
  0x50   :  { %558 = vmatpush.bf16.msrb.mxu1 %v3140_v59  ;;  %v3232_v47 = vor.u32 %v4417_v40, %v3229_v41  ;;  %v4410_v40 = vld [vmem:[#allocation7 + $0x204] sm:$0xf0]  ;;  %v4409_v41 = vld [vmem:[#allocation7 + $0x204] sm:$0xf]  ;;  %v3259_v51 = vld [vmem:[#allocation7 + $0x280] sm:$0xf] }
  0x51   :  { %571 = vmatpush.bf16.msrb.mxu2 %v3080_v43  ;;  %v3300_v43 = vor.u32 %v4436_v38, %v3299_v37  ;;  %v3277_v37 = vld [vmem:[#allocation7 + $0x2a8] sm:$0xf0]  ;;  %v3196_v42 = vor.u32 %v4410_v40, %v3195_v39  ;;  %v4450_v23 = vld [vmem:[#allocation7 + $0x344] sm:$0xf0]  ;;  %v4447_v40 = vld [vmem:[#allocation7 + $0x334] sm:$0xf] }
  0x52   :  { %584 = vmatpush.bf16.msrb.mxu3 %v3144_v61  ;;  %v3280_v38 = vor.u32 %v4429_v35, %v3277_v37  ;;  %v3347_v37 = vld [vmem:[#allocation7 + $0x330] sm:$0xf] }
  0x53   :  { %546 = vmatpush.bf16.msrb.mxu0 %v3068_v53  ;;  %v3220_v53 = vor.u32 %v4416_v49, %v3219_v48  ;;  %v3269_v49 = vld [vmem:[#allocation7 + $0x298] sm:$0xf0] }
  0x54   :  { %559 = vmatpush.bf16.msrb.mxu1 %v3132_v1 }
  0x55   :  { %572 = vmatpush.bf16.msrb.mxu2 %v3072_v55 }
  0x56   :  { %585 = vmatpush.bf16.msrb.mxu3 %v3136_v3 }
  0x57   :  { %799 = vmatpush.bf16.msra.mxu0 %v3252_v7 }
  0x58   :  { %812 = vmatpush.bf16.msra.mxu1 %v3316_v20  ;;  %v3283_v20 = vld [vmem:[#allocation7 + $0x2b0] sm:$0xf] }
  0x59   :  { %825 = vmatpush.bf16.msra.mxu2 %v3256_v11  ;;  %v4433_v11 = vld [vmem:[#allocation7 + $0x2c4] sm:$0xf]  ;;  %v3284_v25 = vor.u32 %v4432_v22, %v3283_v20  ;;  %v3355_v22 = vld [vmem:[#allocation7 + $0x340] sm:$0xf] }
  0x5a   :  { %838 = vmatpush.bf16.msra.mxu3 %v3320_v21  ;;  %v3296_v16 = vor.u32 %v4433_v11, %v3293_v13  ;;  %v3363_v11 = vld [vmem:[#allocation7 + $0x350] sm:$0xf]  ;;  %v4451_v13 = vld [vmem:[#allocation7 + $0x354] sm:$0xf]  ;;  %v3356_v35 = vor.u32 %v4450_v23, %v3355_v22  ;;  %v3403_v22 = vld [vmem:[#allocation7 + $0x3a0] sm:$0xf] }
  0x5b   :  { %800 = vmatpush.bf16.msra.mxu0 %v3244_v15  ;;  %v4414_v15 = vld [vmem:[#allocation7 + $0x224] sm:$0xf0] }
  0x5c   :  { %813 = vmatpush.bf16.msra.mxu1 %v3308_v28  ;;  %v3212_v17 = vor.u32 %v4414_v15, %v3211_v14  ;;  %v4412_v28 = vld [vmem:[#allocation7 + $0x214] sm:$0xf0]  ;;  %v3365_v14 = vld [vmem:[#allocation7 + $0x358] sm:$0xf0]  ;;  %v3435_v15 = vld [vmem:[#allocation7 + $0x3e0] sm:$0xf] }
  0x5d   :  { %826 = vmatpush.bf16.msra.mxu2 %v3248_v19  ;;  %v3213_v19 = vld [vmem:[#allocation7 + $0x228] sm:$0xf0]  ;;  %v3204_v30 = vor.u32 %v4412_v28, %v3203_v27  ;;  %v3368_v24 = vor.u32 %v4451_v13, %v3365_v14  ;;  %v4467_v27 = vld [vmem:[#allocation7 + $0x3d4] sm:$0xf]  ;;  %v4449_v28 = vld [vmem:[#allocation7 + $0x344] sm:$0xf] }
  0x5e   :  { %839 = vmatpush.bf16.msra.mxu3 %v3312_v33  ;;  %v3216_v21 = vor.u32 %v4413_v18, %v3213_v19  ;;  %v3275_v33 = vld [vmem:[#allocation7 + $0x2a0] sm:$0xf]  ;;  %v4469_v18 = vld [vmem:[#allocation7 + $0x3e4] sm:$0xf]  ;;  %v3437_v19 = vld [vmem:[#allocation7 + $0x3e8] sm:$0xf0] }
  0x5f   :  { %801 = vmatpush.bf16.msra.mxu0 %v3236_v32  ;;  %v3208_v32 = vor.u32 %v4411_v29, %v3205_v31  ;;  %v3357_v29 = vld [vmem:[#allocation7 + $0x348] sm:$0xf0]  ;;  %v373_v31 = vld [vmem:[#allocation8 + $0x1] ss:$8 sm:$0x3] }
  0x60   :  { %814 = vmatpush.bf16.msra.mxu1 %v3300_v43  ;;  %v3197_v43 = vld [vmem:[#allocation7 + $0x208] sm:$0xf0]  ;;  %v375_v39 = vperm.slane %v373_v31, 0  ;;  %v4463_v13 = vld [vmem:[#allocation7 + $0x3b4] sm:$0xf] }
  0x61   :  { %827 = vmatpush.bf16.msra.mxu2 %v3240_v36  ;;  %v3276_v36 = vor.u32 %v4430_v34, %v3275_v33  ;;  %v3413_v14 = vld [vmem:[#allocation7 + $0x3b8] sm:$0xf0]  ;;  %v4462_v23 = vld [vmem:[#allocation7 + $0x3a4] sm:$0xf0] }
  0x62   :  { %840 = vmatpush.bf16.msra.mxu3 %v3304_v44  ;;  %v3200_v44 = vor.u32 %v4409_v41, %v3197_v43  ;;  %v3349_v41 = vld [vmem:[#allocation7 + $0x338] sm:$0xf0] }
  0x63   :  { %802 = vmatpush.bf16.msra.mxu0 %v3228_v45  ;;  %v3267_v45 = vld [vmem:[#allocation7 + $0x290] sm:$0xf]  ;;  %v3352_v43 = vor.u32 %v4447_v40, %v3349_v41  ;;  %v3387_v40 = vld [vmem:[#allocation7 + $0x380] sm:$0xf]  ;;  %v4458_v41 = vld [vmem:[#allocation7 + $0x384] sm:$0xf0] }
  0x64   :  { %815 = vmatpush.bf16.msra.mxu1 %v3292_v12  ;;  %v4452_v12 = vld [vmem:[#allocation7 + $0x354] sm:$0xf0] }
  0x65   :  { %828 = vmatpush.bf16.msra.mxu2 %v3232_v47  ;;  %v4427_v47 = vld [vmem:[#allocation7 + $0x294] sm:$0xf]  ;;  %v3364_v20 = vor.u32 %v4452_v12, %v3363_v11 }
  0x66   :  { %841 = vmatpush.bf16.msra.mxu3 %v3296_v16  ;;  %v3272_v50 = vor.u32 %v4427_v47, %v3269_v49  ;;  %v4470_v16 = vld [vmem:[#allocation7 + $0x3e4] sm:$0xf0] }
  0x67   :  { %803 = vmatpush.bf16.msra.mxu0 %v3220_v53  ;;  %v4425_v53 = vld [vmem:[#allocation7 + $0x284] sm:$0xf] }
  0x68   :  { %816 = vmatpush.bf16.msra.mxu1 %v3284_v25  ;;  %v3427_v25 = vld [vmem:[#allocation7 + $0x3d0] sm:$0xf] }
  0x69   :  { %829 = vmatpush.bf16.msra.mxu2 %v3224_v56 }
  0x6a   :  { %842 = vmatpush.bf16.msra.mxu3 %v3288_v26  ;;  %v4468_v26 = vld [vmem:[#allocation7 + $0x3d4] sm:$0xf0] }
  0x6b   :  { %804 = vmatpush.bf16.msra.mxu0 %v3212_v17  ;;  %v3436_v17 = vor.u32 %v4470_v16, %v3435_v15  ;;  %v3416_v15 = vor.u32 %v4463_v13, %v3413_v14  ;;  %v3331_v16 = vld [vmem:[#allocation7 + $0x310] sm:$0xf] }
  0x6c   :  { %817 = vmatpush.bf16.msra.mxu1 %v3276_v36  ;;  %v3360_v36 = vor.u32 %v4449_v28, %v3357_v29  ;;  %v3323_v28 = vld [vmem:[#allocation7 + $0x300] sm:$0xf]  ;;  %v4442_v29 = vld [vmem:[#allocation7 + $0x304] sm:$0xf0]  ;;  %v3555_v14 = vld [vmem:[#allocation7 + $0x4d0] sm:$0xf] }
  0x6d   :  { %830 = vmatpush.bf16.msra.mxu2 %v3216_v21  ;;  %v3440_v21 = vor.u32 %v4469_v18, %v3437_v19  ;;  %v4443_v18 = vld [vmem:[#allocation7 + $0x314] sm:$0xf] }
  0x6e   :  { %843 = vmatpush.bf16.msra.mxu3 %v3280_v38  ;;  %v4448_v38 = vld [vmem:[#allocation7 + $0x334] sm:$0xf0] }
  0x6f   :  { %805 = vmatpush.bf16.msra.mxu0 %v3204_v30  ;;  %v3429_v30 = vld [vmem:[#allocation7 + $0x3d8] sm:$0xf0] }
  0x70   :  { %v3432_v33 = vor.u32 %v4467_v27, %v3429_v30  ;;  %v4441_v30 = vld [vmem:[#allocation7 + $0x304] sm:$0xf] }
  0x71   :  { %831 = vmatpush.bf16.msra.mxu2 %v3208_v32  ;;  %v3428_v32 = vor.u32 %v4468_v26, %v3427_v25  ;;  %v3404_v25 = vor.u32 %v4462_v23, %v3403_v22  ;;  %v3405_v26 = vld [vmem:[#allocation7 + $0x3a8] sm:$0xf0] }
  0x72   :  { %844 = vmatpush.bf16.msra.mxu3 %v3272_v50 }
  0x73   :  { %806 = vmatpush.bf16.msra.mxu0 %v3196_v42  ;;  %v3348_v42 = vor.u32 %v4448_v38, %v3347_v37  ;;  %v3397_v38 = vld [vmem:[#allocation7 + $0x398] sm:$0xf0] }
  0x75   :  { %832 = vmatpush.bf16.msra.mxu2 %v3200_v44 }
  0xb3   :  { %v288_v52 = vpop.f32.mrf.mxu0 }
  0xb4   :  { %v289_v54 = vadd.f32 %v288_v52, %v115_v46  ;;  %v301_v55 = vpop.f32.mrf.mxu1  ;;  %v4428_v46 = vld [vmem:[#allocation7 + $0x294] sm:$0xf0]  ;;  %v4426_v52 = vld [vmem:[#allocation7 + $0x284] sm:$0xf0] }
  0xb5   :  { %v3268_v48 = vor.u32 %v4428_v46, %v3267_v45 }
  0xb6   :  { %v302_v57 = vadd.f32 %v301_v55, %v289_v54  ;;  %v3260_v54 = vor.u32 %v4426_v52, %v3259_v51  ;;  %v3261_v55 = vld [vmem:[#allocation7 + $0x288] sm:$0xf0] }
  0xb7   :  { %818 = vmatpush.bf16.msra.mxu1 %v3268_v48  ;;  %v3264_v56 = vor.u32 %v4425_v53, %v3261_v55  ;;  %v376_v48 = vperm.slane %v373_v31, 1  ;;  %v3324_v31 = vor.u32 %v4442_v29, %v3323_v28  ;;  %v4479_v29 = vld [vmem:[#allocation7 + $0x434] sm:$0xf] }
  0xb8   :  { %vm331_vm0 = vcmp.gt.f32.partialorder %v302_v57, 0.0  ;;  %v333_v59 = vmul.f32 0.01, %v302_v57 }
  0xb9   :  { %845 = vmatpush.bf16.msra.mxu3 %v3264_v56 }
  0xba   :  { %v335_v61 = vsel %vm331_vm0, %v302_v57, %v333_v59  ;;  %v3379_v57 = vld [vmem:[#allocation7 + $0x370] sm:$0xf]  ;;  %v4455_v59 = vld [vmem:[#allocation7 + $0x374] sm:$0xf] }
  0xbb   :  { %v314_v60 = vpop.f32.mrf.mxu2  ;;  %v290_v0 = vpop.f32.mrf.mxu0  ;;  %v337_v1 = vpack.c.bf16 %v335_v61, %v335_v61  ;;  %819 = vmatpush.bf16.msra.mxu1 %v3260_v54  ;;  %v3381_v61 = vld [vmem:[#allocation7 + $0x378] sm:$0xf0] }
  0xbc   :  { %v315_v62 = vadd.f32 %v314_v60, %v116_v58  ;;  %v327_v63 = vpop.f32.mrf.mxu3  ;;  %v303_v2 = vpop.f32.mrf.mxu1  ;;  %v4456_v58 = vld [vmem:[#allocation7 + $0x374] sm:$0xf0]  ;;  %v3384_v0 = vor.u32 %v4455_v59, %v3381_v61 }
  0xbd   :  { %547 = vmatmul.bf16.vlgmr.msrb.gmra.mxu0 %v337_v1  ;;  %573 = vmatmul.bf16.vlgmr.msrb.gmra.mxu2 %v337_v1  ;;  %v3380_v60 = vor.u32 %v4456_v58, %v3379_v57  ;;  %v4453_v1 = vld [vmem:[#allocation7 + $0x364] sm:$0xf]  ;;  %v3373_v2 = vld [vmem:[#allocation7 + $0x368] sm:$0xf0] }
  0xbe   :  { %v328_v3 = vadd.f32 %v327_v63, %v315_v62  ;;  %v3371_v62 = vld [vmem:[#allocation7 + $0x360] sm:$0xf]  ;;  %v4454_v63 = vld [vmem:[#allocation7 + $0x364] sm:$0xf0]  ;;  %1085 = vmatpush.bf16.msrb.mxu2 %v3384_v0  ;;  %v4465_v0 = vld [vmem:[#allocation7 + $0x3c4] sm:$0xf] }
  0xbf   :  { %1059 = vmatpush.bf16.msrb.mxu0 %v3380_v60 }
  0xc0   :  { %vm332_vm1 = vcmp.gt.f32.partialorder %v328_v3, 0.0  ;;  %v334_v4 = vmul.f32 0.01, %v328_v3 }
  0xc2   :  { %v336_v5 = vsel %vm332_vm1, %v328_v3, %v334_v4  ;;  %v3443_v3 = vld [vmem:[#allocation7 + $0x3f0] sm:$0xf]  ;;  %v3372_v4 = vor.u32 %v4454_v63, %v3371_v62  ;;  %v3419_v62 = vld [vmem:[#allocation7 + $0x3c0] sm:$0xf]  ;;  %v4466_v63 = vld [vmem:[#allocation7 + $0x3c4] sm:$0xf0] }
  0xc3   :  { %v316_v6 = vpop.f32.mrf.mxu2  ;;  %v338_v7 = vpack.c.bf16 %v336_v5, %v336_v5  ;;  %v4472_v5 = vld [vmem:[#allocation7 + $0x3f4] sm:$0xf0] }
  0xc4   :  { %v329_v8 = vpop.f32.mrf.mxu3  ;;  %v4471_v6 = vld [vmem:[#allocation7 + $0x3f4] sm:$0xf]  ;;  %v3444_v9 = vor.u32 %v4472_v5, %v3443_v3  ;;  %1060 = vmatpush.bf16.msrb.mxu0 %v3372_v4  ;;  %v3339_v4 = vld [vmem:[#allocation7 + $0x320] sm:$0xf]  ;;  %v4446_v5 = vld [vmem:[#allocation7 + $0x324] sm:$0xf0] }
  0xc5   :  { %560 = vmatmul.bf16.vlgmr.msrb.gmra.mxu1 %v338_v7  ;;  %586 = vmatmul.bf16.vlgmr.msrb.gmra.mxu3 %v338_v7  ;;  %v3445_v7 = vld [vmem:[#allocation7 + $0x3f8] sm:$0xf0]  ;;  %v3376_v8 = vor.u32 %v4453_v1, %v3373_v2  ;;  %v3420_v1 = vor.u32 %v4466_v63, %v3419_v62  ;;  %v3421_v2 = vld [vmem:[#allocation7 + $0x3c8] sm:$0xf0] }
  0xc6   :  { %v3448_v10 = vor.u32 %v4471_v6, %v3445_v7  ;;  %1072 = vmatpush.bf16.msrb.mxu1 %v3444_v9  ;;  %v3424_v3 = vor.u32 %v4465_v0, %v3421_v2  ;;  %v4445_v6 = vld [vmem:[#allocation7 + $0x324] sm:$0xf]  ;;  %v3340_v7 = vor.u32 %v4446_v5, %v3339_v4  ;;  %v3411_v9 = vld [vmem:[#allocation7 + $0x3b0] sm:$0xf]  ;;  %v4483_v2 = vld [vmem:[#allocation7 + $0x454] sm:$0xf] }
  0xc7   :  { %1086 = vmatpush.bf16.msrb.mxu2 %v3376_v8  ;;  %v3341_v8 = vld [vmem:[#allocation7 + $0x328] sm:$0xf0]  ;;  %v3491_v0 = vld [vmem:[#allocation7 + $0x450] sm:$0xf]  ;;  %v3563_v4 = vld [vmem:[#allocation7 + $0x4e0] sm:$0xf] }
  0xc8   :  { %1098 = vmatpush.bf16.msrb.mxu3 %v3448_v10  ;;  %1061 = vmatpush.bf16.msrb.mxu0 %v3364_v20  ;;  %v4464_v10 = vld [vmem:[#allocation7 + $0x3b4] sm:$0xf0]  ;;  %v3344_v11 = vor.u32 %v4445_v6, %v3341_v8  ;;  %v3333_v20 = vld [vmem:[#allocation7 + $0x318] sm:$0xf0]  ;;  %v4502_v5 = vld [vmem:[#allocation7 + $0x4e4] sm:$0xf0] }
  0xc9   :  { %v3412_v12 = vor.u32 %v4464_v10, %v3411_v9  ;;  %v3564_v6 = vor.u32 %v4502_v5, %v3563_v4  ;;  %v3565_v8 = vld [vmem:[#allocation7 + $0x4e8] sm:$0xf0]  ;;  %v3459_v5 = vld [vmem:[#allocation7 + $0x410] sm:$0xf] }
  0xca   :  { %1073 = vmatpush.bf16.msrb.mxu1 %v3436_v17  ;;  %v4444_v17 = vld [vmem:[#allocation7 + $0x314] sm:$0xf0] }
  0xcb   :  { %1087 = vmatpush.bf16.msrb.mxu2 %v3368_v24  ;;  %v3332_v19 = vor.u32 %v4444_v17, %v3331_v16  ;;  %v4461_v24 = vld [vmem:[#allocation7 + $0x3a4] sm:$0xf]  ;;  %v4499_v16 = vld [vmem:[#allocation7 + $0x4d4] sm:$0xf] }
  0xcc   :  { %1099 = vmatpush.bf16.msrb.mxu3 %v3440_v21  ;;  %1062 = vmatpush.bf16.msrb.mxu0 %v3356_v35  ;;  %v3336_v21 = vor.u32 %v4443_v18, %v3333_v20  ;;  %v3408_v27 = vor.u32 %v4461_v24, %v3405_v26  ;;  %v4460_v35 = vld [vmem:[#allocation7 + $0x394] sm:$0xf0]  ;;  %v4481_v17 = vld [vmem:[#allocation7 + $0x444] sm:$0xf]  ;;  %v3485_v18 = vld [vmem:[#allocation7 + $0x448] sm:$0xf0] }
  0xcd   :  { %v633_v20 = vld [vmem:[#allocation8 + $0x2] ss:$8 sm:$0x3]  ;;  %v3475_v26 = vld [vmem:[#allocation7 + $0x430] sm:$0xf] }
  0xce   :  { %1074 = vmatpush.bf16.msrb.mxu1 %v3428_v32  ;;  %v3325_v32 = vld [vmem:[#allocation7 + $0x308] sm:$0xf0]  ;;  %v635_v28 = vperm.slane %v633_v20, 0 }
  0xcf   :  { %1088 = vmatpush.bf16.msrb.mxu2 %v3360_v36  ;;  %v4459_v36 = vld [vmem:[#allocation7 + $0x394] sm:$0xf] }
  0xd0   :  { %1100 = vmatpush.bf16.msrb.mxu3 %v3432_v33  ;;  %1063 = vmatpush.bf16.msrb.mxu0 %v3348_v42  ;;  %v3328_v33 = vor.u32 %v4441_v30, %v3325_v32  ;;  %v4457_v42 = vld [vmem:[#allocation7 + $0x384] sm:$0xf]  ;;  %v3477_v30 = vld [vmem:[#allocation7 + $0x438] sm:$0xf0] }
  0xd1   :  { %v3480_v32 = vor.u32 %v4479_v29, %v3477_v30  ;;  %v3515_v29 = vld [vmem:[#allocation7 + $0x480] sm:$0xf]  ;;  %v4490_v30 = vld [vmem:[#allocation7 + $0x484] sm:$0xf0] }
  0xd2   :  { %1075 = vmatpush.bf16.msrb.mxu1 %v3420_v1  ;;  %v4484_v1 = vld [vmem:[#allocation7 + $0x454] sm:$0xf0] }
  0xd3   :  { %1089 = vmatpush.bf16.msrb.mxu2 %v3352_v43  ;;  %v3388_v43 = vor.u32 %v4458_v41, %v3387_v40  ;;  %v3492_v9 = vor.u32 %v4484_v1, %v3491_v0 }
  0xd4   :  { %1101 = vmatpush.bf16.msrb.mxu3 %v3424_v3  ;;  %1064 = vmatpush.bf16.msrb.mxu0 %v3340_v7  ;;  %v3493_v3 = vld [vmem:[#allocation7 + $0x458] sm:$0xf0]  ;;  %v4501_v7 = vld [vmem:[#allocation7 + $0x4e4] sm:$0xf] }
  0xd5   :  { %v3568_v10 = vor.u32 %v4501_v7, %v3565_v8  ;;  %v3496_v13 = vor.u32 %v4483_v2, %v3493_v3  ;;  %v4495_v2 = vld [vmem:[#allocation7 + $0x4b4] sm:$0xf]  ;;  %v3541_v3 = vld [vmem:[#allocation7 + $0x4b8] sm:$0xf0] }
  0xd6   :  { %1076 = vmatpush.bf16.msrb.mxu1 %v3412_v12  ;;  %v4482_v12 = vld [vmem:[#allocation7 + $0x444] sm:$0xf0]  ;;  %v3544_v4 = vor.u32 %v4495_v2, %v3541_v3  ;;  %v4475_v7 = vld [vmem:[#allocation7 + $0x414] sm:$0xf]  ;;  %v3683_v3 = vld [vmem:[#allocation7 + $0x6d0] sm:$0xf] }
  0xd7   :  { %1090 = vmatpush.bf16.msrb.mxu2 %v3344_v11  ;;  %v3483_v11 = vld [vmem:[#allocation7 + $0x440] sm:$0xf] }
  0xd8   :  { %1102 = vmatpush.bf16.msrb.mxu3 %v3416_v15  ;;  %1065 = vmatpush.bf16.msrb.mxu0 %v3332_v19  ;;  %v4500_v15 = vld [vmem:[#allocation7 + $0x4d4] sm:$0xf0]  ;;  %v3557_v19 = vld [vmem:[#allocation7 + $0x4d8] sm:$0xf0]  ;;  %v3484_v23 = vor.u32 %v4482_v12, %v3483_v11  ;;  %v3531_v11 = vld [vmem:[#allocation7 + $0x4a0] sm:$0xf] }
  0xd9   :  { %v3560_v22 = vor.u32 %v4499_v16, %v3557_v19  ;;  %v4494_v12 = vld [vmem:[#allocation7 + $0x4a4] sm:$0xf0]  ;;  %v4473_v19 = vld [vmem:[#allocation7 + $0x404] sm:$0xf] }
  0xda   :  { %1077 = vmatpush.bf16.msrb.mxu1 %v3404_v25  ;;  %v3488_v25 = vor.u32 %v4481_v17, %v3485_v18  ;;  %v3451_v17 = vld [vmem:[#allocation7 + $0x400] sm:$0xf]  ;;  %v4474_v18 = vld [vmem:[#allocation7 + $0x404] sm:$0xf0] }
  0xdb   :  { %1091 = vmatpush.bf16.msrb.mxu2 %v3336_v21  ;;  %v3556_v21 = vor.u32 %v4500_v15, %v3555_v14  ;;  %v3532_v14 = vor.u32 %v4494_v12, %v3531_v11  ;;  %v3533_v15 = vld [vmem:[#allocation7 + $0x4a8] sm:$0xf0]  ;;  %v3675_v12 = vld [vmem:[#allocation7 + $0x6c0] sm:$0xf] }
  0xdc   :  { %1103 = vmatpush.bf16.msrb.mxu3 %v3408_v27  ;;  %1066 = vmatpush.bf16.msrb.mxu0 %v3324_v31  ;;  %v4480_v27 = vld [vmem:[#allocation7 + $0x434] sm:$0xf0] }
  0xdd   :  { %v3476_v31 = vor.u32 %v4480_v27, %v3475_v26  ;;  %v3525_v27 = vld [vmem:[#allocation7 + $0x498] sm:$0xf0] }
  0xdf   :  { %1092 = vmatpush.bf16.msrb.mxu2 %v3328_v33 }
 0x13a   :  { %v548_v34 = vpop.f32.mrf.mxu0 }
 0x13b   :  { %v549_v44 = vadd.f32 %v548_v34, %v375_v39  ;;  %v3395_v34 = vld [vmem:[#allocation7 + $0x390] sm:$0xf]  ;;  %v3400_v39 = vor.u32 %v4459_v36, %v3397_v38 }
 0x13c   :  { %v3396_v37 = vor.u32 %v4460_v35, %v3395_v34 }
 0x13d   :  { %1104 = vmatpush.bf16.msrb.mxu3 %v3400_v39 }
 0x13e   :  { %1078 = vmatpush.bf16.msrb.mxu1 %v3396_v37  ;;  %v636_v37 = vperm.slane %v633_v20, 1  ;;  %v3452_v20 = vor.u32 %v4474_v18, %v3451_v17 }
 0x140   :  { %v574_v45 = vpop.f32.mrf.mxu2 }
 0x141   :  { %v575_v52 = vadd.f32 %v574_v45, %v376_v48  ;;  %v4487_v48 = vld [vmem:[#allocation7 + $0x474] sm:$0xf] }
 0x142   :  { %v561_v46 = vpop.f32.mrf.mxu1  ;;  %v550_v49 = vpop.f32.mrf.mxu0  ;;  %1079 = vmatpush.bf16.msrb.mxu1 %v3388_v43 }
 0x143   :  { %v562_v47 = vadd.f32 %v561_v46, %v549_v44  ;;  %v3389_v44 = vld [vmem:[#allocation7 + $0x388] sm:$0xf0]  ;;  %v3507_v46 = vld [vmem:[#allocation7 + $0x470] sm:$0xf] }
 0x144   :  { %v3392_v45 = vor.u32 %v4457_v42, %v3389_v44 }
 0x145   :  { %vm591_vm2 = vcmp.gt.f32.partialorder %v562_v47, 0.0  ;;  %v593_v50 = vmul.f32 0.01, %v562_v47 }
 0x146   :  { %1105 = vmatpush.bf16.msrb.mxu3 %v3392_v45 }
 0x147   :  { %v595_v51 = vsel %vm591_vm2, %v562_v47, %v593_v50  ;;  %v4488_v47 = vld [vmem:[#allocation7 + $0x474] sm:$0xf0]  ;;  %v3509_v50 = vld [vmem:[#allocation7 + $0x478] sm:$0xf0] }
 0x148   :  { %v597_v53 = vpack.c.bf16 %v595_v51, %v595_v51  ;;  %v587_v54 = vpop.f32.mrf.mxu3  ;;  %v576_v56 = vpop.f32.mrf.mxu2  ;;  %v3508_v49 = vor.u32 %v4488_v47, %v3507_v46  ;;  %v3499_v51 = vld [vmem:[#allocation7 + $0x460] sm:$0xf] }
 0x149   :  { %v588_v55 = vadd.f32 %v587_v54, %v575_v52  ;;  %v4486_v52 = vld [vmem:[#allocation7 + $0x464] sm:$0xf0]  ;;  %v4485_v54 = vld [vmem:[#allocation7 + $0x464] sm:$0xf]  ;;  %v3571_v56 = vld [vmem:[#allocation7 + $0x4f0] sm:$0xf] }
 0x14a   :  { %v563_v57 = vpop.f32.mrf.mxu1  ;;  %807 = vmatmul.bf16.vlgmr.msra.gmra.mxu0 %v597_v53  ;;  %833 = vmatmul.bf16.vlgmr.msra.gmra.mxu2 %v597_v53  ;;  %v3512_v53 = vor.u32 %v4487_v48, %v3509_v50 }
 0x14b   :  { %vm592_vm3 = vcmp.gt.f32.partialorder %v588_v55, 0.0  ;;  %v594_v58 = vmul.f32 0.01, %v588_v55  ;;  %1319 = vmatpush.bf16.msra.mxu0 %v3508_v49  ;;  %v3500_v57 = vor.u32 %v4486_v52, %v3499_v51  ;;  %v3547_v51 = vld [vmem:[#allocation7 + $0x4c0] sm:$0xf] }
 0x14c   :  { %1345 = vmatpush.bf16.msra.mxu2 %v3512_v53  ;;  %v4498_v52 = vld [vmem:[#allocation7 + $0x4c4] sm:$0xf0]  ;;  %v4497_v53 = vld [vmem:[#allocation7 + $0x4c4] sm:$0xf] }
 0x14d   :  { %v596_v59 = vsel %vm592_vm3, %v588_v55, %v594_v58  ;;  %v3501_v55 = vld [vmem:[#allocation7 + $0x468] sm:$0xf0]  ;;  %v4504_v58 = vld [vmem:[#allocation7 + $0x4f4] sm:$0xf0] }
 0x14e   :  { %v598_v60 = vpack.c.bf16 %v596_v59, %v596_v59  ;;  %v4503_v59 = vld [vmem:[#allocation7 + $0x4f4] sm:$0xf]  ;;  %v3572_v62 = vor.u32 %v4504_v58, %v3571_v56  ;;  %v4478_v58 = vld [vmem:[#allocation7 + $0x424] sm:$0xf0] }
 0x14f   :  { %1320 = vmatpush.bf16.msra.mxu0 %v3500_v57  ;;  %v3467_v57 = vld [vmem:[#allocation7 + $0x420] sm:$0xf] }
 0x150   :  { %v589_v61 = vpop.f32.mrf.mxu3  ;;  %820 = vmatmul.bf16.vlgmr.msra.gmra.mxu1 %v598_v60  ;;  %846 = vmatmul.bf16.vlgmr.msra.gmra.mxu3 %v598_v60  ;;  %v3573_v60 = vld [vmem:[#allocation7 + $0x4f8] sm:$0xf0] }
 0x151   :  { %v3504_v61 = vor.u32 %v4485_v54, %v3501_v55  ;;  %v3576_v63 = vor.u32 %v4503_v59, %v3573_v60  ;;  %1332 = vmatpush.bf16.msra.mxu1 %v3572_v62  ;;  %v3548_v54 = vor.u32 %v4498_v52, %v3547_v51  ;;  %v3549_v55 = vld [vmem:[#allocation7 + $0x4c8] sm:$0xf0]  ;;  %v4477_v59 = vld [vmem:[#allocation7 + $0x424] sm:$0xf]  ;;  %v3468_v60 = vor.u32 %v4478_v58, %v3467_v57  ;;  %v3539_v62 = vld [vmem:[#allocation7 + $0x4b0] sm:$0xf] }
 0x152   :  { %v3552_v56 = vor.u32 %v4497_v53, %v3549_v55  ;;  %v3619_v53 = vld [vmem:[#allocation7 + $0x650] sm:$0xf]  ;;  %v4547_v55 = vld [vmem:[#allocation7 + $0x654] sm:$0xf]  ;;  %v3691_v57 = vld [vmem:[#allocation7 + $0x6e0] sm:$0xf] }
 0x153   :  { %1358 = vmatpush.bf16.msra.mxu3 %v3576_v63  ;;  %1346 = vmatpush.bf16.msra.mxu2 %v3504_v61  ;;  %v3469_v61 = vld [vmem:[#allocation7 + $0x428] sm:$0xf0]  ;;  %v4496_v63 = vld [vmem:[#allocation7 + $0x4b4] sm:$0xf0]  ;;  %v4566_v58 = vld [vmem:[#allocation7 + $0x6e4] sm:$0xf0] }
 0x154   :  { %1321 = vmatpush.bf16.msra.mxu0 %v3492_v9  ;;  %v3472_v0 = vor.u32 %v4477_v59, %v3469_v61  ;;  %v3540_v1 = vor.u32 %v4496_v63, %v3539_v62  ;;  %v3461_v9 = vld [vmem:[#allocation7 + $0x418] sm:$0xf0]  ;;  %v3692_v59 = vor.u32 %v4566_v58, %v3691_v57  ;;  %v3693_v61 = vld [vmem:[#allocation7 + $0x6e8] sm:$0xf0] }
 0x155   :  { %1333 = vmatpush.bf16.msra.mxu1 %v3564_v6  ;;  %v4476_v6 = vld [vmem:[#allocation7 + $0x414] sm:$0xf0] }
 0x156   :  { %v3460_v8 = vor.u32 %v4476_v6, %v3459_v5  ;;  %v4563_v5 = vld [vmem:[#allocation7 + $0x6d4] sm:$0xf]  ;;  %v4545_v6 = vld [vmem:[#allocation7 + $0x644] sm:$0xf] }
 0x157   :  { %1359 = vmatpush.bf16.msra.mxu3 %v3568_v10  ;;  %1347 = vmatpush.bf16.msra.mxu2 %v3496_v13  ;;  %v3464_v10 = vor.u32 %v4475_v7, %v3461_v9  ;;  %v4493_v13 = vld [vmem:[#allocation7 + $0x4a4] sm:$0xf]  ;;  %v3613_v7 = vld [vmem:[#allocation7 + $0x648] sm:$0xf0] }
 0x158   :  { %1322 = vmatpush.bf16.msra.mxu0 %v3484_v23  ;;  %v3536_v16 = vor.u32 %v4493_v13, %v3533_v15  ;;  %v3523_v23 = vld [vmem:[#allocation7 + $0x490] sm:$0xf]  ;;  %v4880_v9 = vld [vmem:[#allocation8 + $0x3] ss:$8 sm:$0x3]  ;;  %v3616_v18 = vor.u32 %v4545_v6, %v3613_v7 }
 0x159   :  { %1334 = vmatpush.bf16.msra.mxu1 %v3556_v21  ;;  %v3453_v21 = vld [vmem:[#allocation7 + $0x408] sm:$0xf0]  ;;  %v4561_v15 = vld [vmem:[#allocation7 + $0x6c4] sm:$0xf]  ;;  %v3763_v6 = vld [vmem:[#allocation7 + $0x570] sm:$0xf] }
 0x15a   :  { %v4520_v7 = vld [vmem:[#allocation7 + $0x574] sm:$0xf0] }
 0x15b   :  { %1360 = vmatpush.bf16.msra.mxu3 %v3560_v22  ;;  %1348 = vmatpush.bf16.msra.mxu2 %v3488_v25  ;;  %v3456_v22 = vor.u32 %v4473_v19, %v3453_v21  ;;  %v4491_v25 = vld [vmem:[#allocation7 + $0x494] sm:$0xf]  ;;  %v3603_v19 = vld [vmem:[#allocation7 + $0x630] sm:$0xf]  ;;  %v895_v21 = vperm.slane %v4880_v9, 0 }
 0x15c   :  { %1323 = vmatpush.bf16.msra.mxu0 %v3476_v31  ;;  %v4489_v31 = vld [vmem:[#allocation7 + $0x484] sm:$0xf] }
 0x15d   :  { %1335 = vmatpush.bf16.msra.mxu1 %v3548_v54  ;;  %v4548_v54 = vld [vmem:[#allocation7 + $0x654] sm:$0xf0] }
 0x15e   :  { %v3620_v62 = vor.u32 %v4548_v54, %v3619_v53  ;;  %v3661_v54 = vld [vmem:[#allocation7 + $0x6a8] sm:$0xf0] }
 0x15f   :  { %1349 = vmatpush.bf16.msra.mxu2 %v3480_v32  ;;  %1361 = vmatpush.bf16.msra.mxu3 %v3552_v56  ;;  %v3516_v32 = vor.u32 %v4490_v30, %v3515_v29  ;;  %v3621_v56 = vld [vmem:[#allocation7 + $0x658] sm:$0xf0]  ;;  %v4559_v29 = vld [vmem:[#allocation7 + $0x6b4] sm:$0xf] }
 0x160   :  { %1324 = vmatpush.bf16.msra.mxu0 %v3468_v60  ;;  %v4565_v60 = vld [vmem:[#allocation7 + $0x6e4] sm:$0xf]  ;;  %v3624_v2 = vor.u32 %v4547_v55, %v3621_v56  ;;  %v3669_v30 = vld [vmem:[#allocation7 + $0x6b8] sm:$0xf0] }
 0x161   :  { %1336 = vmatpush.bf16.msra.mxu1 %v3540_v1  ;;  %v3696_v63 = vor.u32 %v4565_v60, %v3693_v61  ;;  %v4546_v1 = vld [vmem:[#allocation7 + $0x644] sm:$0xf0] }
 0x162   :  { %v4538_v60 = vld [vmem:[#allocation7 + $0x604] sm:$0xf0] }
 0x163   :  { %1350 = vmatpush.bf16.msra.mxu2 %v3472_v0  ;;  %1362 = vmatpush.bf16.msra.mxu3 %v3544_v4  ;;  %v3611_v0 = vld [vmem:[#allocation7 + $0x640] sm:$0xf]  ;;  %v4564_v4 = vld [vmem:[#allocation7 + $0x6d4] sm:$0xf0] }
 0x164   :  { %1325 = vmatpush.bf16.msra.mxu0 %v3460_v8  ;;  %v3685_v8 = vld [vmem:[#allocation7 + $0x6d8] sm:$0xf0]  ;;  %v3612_v13 = vor.u32 %v4546_v1, %v3611_v0  ;;  %v4537_v1 = vld [vmem:[#allocation7 + $0x604] sm:$0xf] }
 0x165   :  { %1337 = vmatpush.bf16.msra.mxu1 %v3532_v14  ;;  %v3688_v11 = vor.u32 %v4563_v5, %v3685_v8  ;;  %v4562_v14 = vld [vmem:[#allocation7 + $0x6c4] sm:$0xf0]  ;;  %v3581_v5 = vld [vmem:[#allocation7 + $0x608] sm:$0xf0] }
 0x167   :  { %1351 = vmatpush.bf16.msra.mxu2 %v3464_v10  ;;  %1363 = vmatpush.bf16.msra.mxu3 %v3536_v16  ;;  %v3684_v10 = vor.u32 %v4564_v4, %v3683_v3  ;;  %v3677_v16 = vld [vmem:[#allocation7 + $0x6c8] sm:$0xf0]  ;;  %v4556_v3 = vld [vmem:[#allocation7 + $0x694] sm:$0xf0] }
 0x168   :  { %1326 = vmatpush.bf16.msra.mxu0 %v3452_v20  ;;  %v4544_v20 = vld [vmem:[#allocation7 + $0x634] sm:$0xf0] }
 0x16b   :  { %1352 = vmatpush.bf16.msra.mxu2 %v3456_v22  ;;  %v4543_v22 = vld [vmem:[#allocation7 + $0x634] sm:$0xf] }
 0x1c7   :  { %v808_v24 = vpop.f32.mrf.mxu0 }
 0x1c8   :  { %v809_v33 = vadd.f32 %v808_v24, %v635_v28  ;;  %v4492_v24 = vld [vmem:[#allocation7 + $0x494] sm:$0xf0]  ;;  %v3528_v28 = vor.u32 %v4491_v25, %v3525_v27  ;;  %v3680_v25 = vor.u32 %v4561_v15, %v3677_v16  ;;  %v3604_v27 = vor.u32 %v4544_v20, %v3603_v19  ;;  %v3653_v16 = vld [vmem:[#allocation7 + $0x698] sm:$0xf0] }
 0x1c9   :  { %v3524_v26 = vor.u32 %v4492_v24, %v3523_v23  ;;  %v3605_v23 = vld [vmem:[#allocation7 + $0x638] sm:$0xf0]  ;;  %v3676_v24 = vor.u32 %v4562_v14, %v3675_v12  ;;  %v4555_v12 = vld [vmem:[#allocation7 + $0x694] sm:$0xf]  ;;  %v3584_v20 = vor.u32 %v4537_v1, %v3581_v5  ;;  %v4512_v5 = vld [vmem:[#allocation7 + $0x534] sm:$0xf0] }
 0x1ca   :  { %1364 = vmatpush.bf16.msra.mxu3 %v3528_v28  ;;  %v4560_v28 = vld [vmem:[#allocation7 + $0x6b4] sm:$0xf0] }
 0x1cb   :  { %1338 = vmatpush.bf16.msra.mxu1 %v3524_v26  ;;  %v3667_v26 = vld [vmem:[#allocation7 + $0x6b0] sm:$0xf] }
 0x1cd   :  { %v821_v34 = vpop.f32.mrf.mxu1  ;;  %v834_v35 = vpop.f32.mrf.mxu2 }
 0x1ce   :  { %v822_v36 = vadd.f32 %v821_v34, %v809_v33  ;;  %v835_v41 = vadd.f32 %v834_v35, %v636_v37  ;;  %v3517_v33 = vld [vmem:[#allocation7 + $0x488] sm:$0xf0]  ;;  %v3635_v35 = vld [vmem:[#allocation7 + $0x670] sm:$0xf]  ;;  %v4551_v37 = vld [vmem:[#allocation7 + $0x674] sm:$0xf] }
 0x1cf   :  { %v810_v38 = vpop.f32.mrf.mxu0  ;;  %v3520_v34 = vor.u32 %v4489_v31, %v3517_v33  ;;  %1339 = vmatpush.bf16.msra.mxu1 %v3516_v32  ;;  %v3608_v31 = vor.u32 %v4543_v22, %v3605_v23  ;;  %v3595_v32 = vld [vmem:[#allocation7 + $0x620] sm:$0xf]  ;;  %v4542_v33 = vld [vmem:[#allocation7 + $0x624] sm:$0xf0]  ;;  %v3827_v22 = vld [vmem:[#allocation7 + $0x5f0] sm:$0xf] }
 0x1d0   :  { %vm851_vm4 = vcmp.gt.f32.partialorder %v822_v36, 0.0  ;;  %v853_v39 = vmul.f32 0.01, %v822_v36  ;;  %v4536_v23 = vld [vmem:[#allocation7 + $0x5f4] sm:$0xf0] }
 0x1d1   :  { %1365 = vmatpush.bf16.msra.mxu3 %v3520_v34 }
 0x1d2   :  { %v855_v40 = vsel %vm851_vm4, %v822_v36, %v853_v39  ;;  %v4552_v36 = vld [vmem:[#allocation7 + $0x674] sm:$0xf0]  ;;  %v3637_v39 = vld [vmem:[#allocation7 + $0x678] sm:$0xf0] }
 0x1d3   :  { %v857_v42 = vpack.c.bf16 %v855_v40, %v855_v40  ;;  %v847_v43 = vpop.f32.mrf.mxu3  ;;  %v3636_v38 = vor.u32 %v4552_v36, %v3635_v35  ;;  %v3627_v40 = vld [vmem:[#allocation7 + $0x660] sm:$0xf]  ;;  %v4541_v35 = vld [vmem:[#allocation7 + $0x624] sm:$0xf]  ;;  %v3597_v36 = vld [vmem:[#allocation7 + $0x628] sm:$0xf0] }
 0x1d4   :  { %v848_v44 = vadd.f32 %v847_v43, %v835_v41  ;;  %v4550_v41 = vld [vmem:[#allocation7 + $0x664] sm:$0xf0]  ;;  %v4549_v43 = vld [vmem:[#allocation7 + $0x664] sm:$0xf] }
 0x1d5   :  { %v823_v45 = vpop.f32.mrf.mxu1  ;;  %v836_v46 = vpop.f32.mrf.mxu2  ;;  %1067 = vmatmul.bf16.vlgmr.msrb.gmra.mxu0 %v857_v42  ;;  %1093 = vmatmul.bf16.vlgmr.msrb.gmra.mxu2 %v857_v42  ;;  %v3640_v42 = vor.u32 %v4551_v37, %v3637_v39 }
 0x1d6   :  { %vm852_vm5 = vcmp.gt.f32.partialorder %v848_v44, 0.0  ;;  %v854_v47 = vmul.f32 0.01, %v848_v44  ;;  %v3699_v45 = vld [vmem:[#allocation7 + $0x6f0] sm:$0xf]  ;;  %1603 = vmatpush.bf16.msrb.mxu0 %v3636_v38  ;;  %v3628_v46 = vor.u32 %v4550_v41, %v3627_v40  ;;  %v896_v38 = vperm.slane %v4880_v9, 1 }
 0x1d7   :  { %1629 = vmatpush.bf16.msrb.mxu2 %v3640_v42  ;;  %v3668_v40 = vor.u32 %v4560_v28, %v3667_v26  ;;  %v3672_v41 = vor.u32 %v4559_v29, %v3669_v30  ;;  %v3587_v42 = vld [vmem:[#allocation7 + $0x610] sm:$0xf]  ;;  %v3656_v26 = vor.u32 %v4555_v12, %v3653_v16  ;;  %v4518_v28 = vld [vmem:[#allocation7 + $0x564] sm:$0xf0]  ;;  %v4517_v29 = vld [vmem:[#allocation7 + $0x564] sm:$0xf] }
 0x1d8   :  { %v856_v48 = vsel %vm852_vm5, %v848_v44, %v854_v47  ;;  %v3629_v44 = vld [vmem:[#allocation7 + $0x668] sm:$0xf0]  ;;  %v4568_v47 = vld [vmem:[#allocation7 + $0x6f4] sm:$0xf0]  ;;  %v4529_v12 = vld [vmem:[#allocation7 + $0x5c4] sm:$0xf] }
 0x1d9   :  { %v858_v49 = vpack.c.bf16 %v856_v48, %v856_v48  ;;  %v4567_v48 = vld [vmem:[#allocation7 + $0x6f4] sm:$0xf]  ;;  %v3700_v51 = vor.u32 %v4568_v47, %v3699_v45  ;;  %v4540_v45 = vld [vmem:[#allocation7 + $0x614] sm:$0xf0]  ;;  %v3589_v47 = vld [vmem:[#allocation7 + $0x618] sm:$0xf0] }
 0x1da   :  { %1604 = vmatpush.bf16.msrb.mxu0 %v3628_v46  ;;  %v4539_v46 = vld [vmem:[#allocation7 + $0x614] sm:$0xf]  ;;  %v3588_v57 = vor.u32 %v4540_v45, %v3587_v42  ;;  %v3757_v30 = vld [vmem:[#allocation7 + $0x568] sm:$0xf0] }
 0x1db   :  { %v849_v50 = vpop.f32.mrf.mxu3  ;;  %1080 = vmatmul.bf16.vlgmr.msrb.gmra.mxu1 %v858_v49  ;;  %1106 = vmatmul.bf16.vlgmr.msrb.gmra.mxu3 %v858_v49  ;;  %v3701_v49 = vld [vmem:[#allocation7 + $0x6f8] sm:$0xf0] }
 0x1dc   :  { %v3632_v50 = vor.u32 %v4549_v43, %v3629_v44  ;;  %v3704_v52 = vor.u32 %v4567_v48, %v3701_v49  ;;  %1616 = vmatpush.bf16.msrb.mxu1 %v3700_v51  ;;  %v3596_v44 = vor.u32 %v4542_v33, %v3595_v32  ;;  %v3600_v49 = vor.u32 %v4541_v35, %v3597_v36  ;;  %v4558_v51 = vld [vmem:[#allocation7 + $0x6a4] sm:$0xf0]  ;;  %v4553_v32 = vld [vmem:[#allocation7 + $0x684] sm:$0xf]  ;;  %v3645_v33 = vld [vmem:[#allocation7 + $0x688] sm:$0xf0] }
 0x1dd   :  { %v3828_v35 = vor.u32 %v4536_v23, %v3827_v22  ;;  %v4535_v36 = vld [vmem:[#allocation7 + $0x5f4] sm:$0xf]  ;;  %v3648_v42 = vor.u32 %v4553_v32, %v3645_v33  ;;  %v3725_v22 = vld [vmem:[#allocation7 + $0x528] sm:$0xf0] }
 0x1de   :  { %1642 = vmatpush.bf16.msrb.mxu3 %v3704_v52  ;;  %1630 = vmatpush.bf16.msrb.mxu2 %v3632_v50  ;;  %v3659_v50 = vld [vmem:[#allocation7 + $0x6a0] sm:$0xf]  ;;  %v4557_v52 = vld [vmem:[#allocation7 + $0x6a4] sm:$0xf]  ;;  %v4507_v33 = vld [vmem:[#allocation7 + $0x514] sm:$0xf] }
 0x1df   :  { %1605 = vmatpush.bf16.msrb.mxu0 %v3620_v62  ;;  %v3660_v58 = vor.u32 %v4558_v51, %v3659_v50  ;;  %v3664_v0 = vor.u32 %v4557_v52, %v3661_v54  ;;  %v3821_v50 = vld [vmem:[#allocation7 + $0x5e8] sm:$0xf0]  ;;  %v1371_v51 = vld [vmem:[#allocation5] sm:$0xff]  ;;  %v4532_v54 = vld [vmem:[#allocation7 + $0x5d4] sm:$0xf0] }
 0x1e0   :  { %1617 = vmatpush.bf16.msrb.mxu1 %v3692_v59  ;;  %v3579_v59 = vld [vmem:[#allocation7 + $0x600] sm:$0xf] }
 0x1e1   :  { %v3580_v14 = vor.u32 %v4538_v60, %v3579_v59  ;;  %v1408_v59 = vpack.c.bf16 %v1371_v51, %v1371_v51  ;;  %v4513_v60 = vld [vmem:[#allocation7 + $0x544] sm:$0xf] }
 0x1e2   :  { %1643 = vmatpush.bf16.msrb.mxu3 %v3696_v63  ;;  %1631 = vmatpush.bf16.msrb.mxu2 %v3624_v2  ;;  %v3592_v63 = vor.u32 %v4539_v46, %v3589_v47  ;;  %v3651_v2 = vld [vmem:[#allocation7 + $0x690] sm:$0xf]  ;;  %v4515_v46 = vld [vmem:[#allocation7 + $0x554] sm:$0xf]  ;;  %v3749_v47 = vld [vmem:[#allocation7 + $0x558] sm:$0xf0] }
 0x1e3   :  { %1606 = vmatpush.bf16.msrb.mxu0 %v3612_v13  ;;  %v3652_v15 = vor.u32 %v4556_v3, %v3651_v2  ;;  %v1372_v2 = vld [vmem:[#allocation5 + $0x8] sm:$0xff]  ;;  %v3731_v3 = vld [vmem:[#allocation7 + $0x530] sm:$0xf] }
 0x1e4   :  { %1618 = vmatpush.bf16.msrb.mxu1 %v3684_v10  ;;  %v4519_v10 = vld [vmem:[#allocation7 + $0x574] sm:$0xf] }
 0x1e6   :  { %1644 = vmatpush.bf16.msrb.mxu3 %v3688_v11  ;;  %1632 = vmatpush.bf16.msrb.mxu2 %v3616_v18  ;;  %v3765_v11 = vld [vmem:[#allocation7 + $0x578] sm:$0xf0]  ;;  %v4554_v18 = vld [vmem:[#allocation7 + $0x684] sm:$0xf0] }
 0x1e7   :  { %1607 = vmatpush.bf16.msrb.mxu0 %v3604_v27  ;;  %v3755_v27 = vld [vmem:[#allocation7 + $0x560] sm:$0xf] }
 0x1e8   :  { %1619 = vmatpush.bf16.msrb.mxu1 %v3676_v24 }
 0x1ea   :  { %1645 = vmatpush.bf16.msrb.mxu3 %v3680_v25  ;;  %1633 = vmatpush.bf16.msrb.mxu2 %v3608_v31  ;;  %v3768_v25 = vor.u32 %v4519_v10, %v3765_v11  ;;  %v3733_v10 = vld [vmem:[#allocation7 + $0x538] sm:$0xf0]  ;;  %v1409_v11 = vpack.c.bf16 %v1372_v2, %v1372_v2  ;;  %v1153_v2 = vld [vmem:[#allocation8 + $0x4] ss:$8 sm:$0x3] }
 0x1eb   :  { %1608 = vmatpush.bf16.msrb.mxu0 %v3596_v44  ;;  %v4516_v44 = vld [vmem:[#allocation7 + $0x554] sm:$0xf0] }
 0x1ec   :  { %1620 = vmatpush.bf16.msrb.mxu1 %v3668_v40  ;;  %v4534_v40 = vld [vmem:[#allocation7 + $0x5e4] sm:$0xf0] }
 0x1ee   :  { %1646 = vmatpush.bf16.msrb.mxu3 %v3672_v41  ;;  %1634 = vmatpush.bf16.msrb.mxu2 %v3600_v49  ;;  %v3760_v41 = vor.u32 %v4517_v29, %v3757_v30  ;;  %v4533_v49 = vld [vmem:[#allocation7 + $0x5e4] sm:$0xf]  ;;  %v3715_v29 = vld [vmem:[#allocation7 + $0x510] sm:$0xf]  ;;  %v4508_v30 = vld [vmem:[#allocation7 + $0x514] sm:$0xf0] }
 0x1ef   :  { %1609 = vmatpush.bf16.msrb.mxu0 %v3588_v57  ;;  %v4514_v57 = vld [vmem:[#allocation7 + $0x544] sm:$0xf0]  ;;  %v3716_v32 = vor.u32 %v4508_v30, %v3715_v29  ;;  %v3867_v29 = vld [vmem:[#allocation7 + $0x740] sm:$0xf] }
 0x1f0   :  { %1621 = vmatpush.bf16.msrb.mxu1 %v3660_v58  ;;  %v3824_v58 = vor.u32 %v4533_v49, %v3821_v50  ;;  %v4524_v49 = vld [vmem:[#allocation7 + $0x594] sm:$0xf0]  ;;  %v4523_v50 = vld [vmem:[#allocation7 + $0x594] sm:$0xf]  ;;  %v4578_v30 = vld [vmem:[#allocation7 + $0x744] sm:$0xf0] }
 0x1f2   :  { %1635 = vmatpush.bf16.msrb.mxu2 %v3592_v63  ;;  %1647 = vmatpush.bf16.msrb.mxu3 %v3664_v0  ;;  %v4531_v63 = vld [vmem:[#allocation7 + $0x5d4] sm:$0xf]  ;;  %v3813_v0 = vld [vmem:[#allocation7 + $0x5d8] sm:$0xf0] }
 0x1f3   :  { %1610 = vmatpush.bf16.msrb.mxu0 %v3580_v14  ;;  %v3732_v14 = vor.u32 %v4512_v5, %v3731_v3  ;;  %v1155_v3 = vperm.slane %v1153_v2, 0  ;;  %v4582_v5 = vld [vmem:[#allocation7 + $0x764] sm:$0xf0] }
 0x1f4   :  { %1622 = vmatpush.bf16.msrb.mxu1 %v3652_v15 }
 0x1f6   :  { %1636 = vmatpush.bf16.msrb.mxu2 %v3584_v20  ;;  %1648 = vmatpush.bf16.msrb.mxu3 %v3656_v26  ;;  %v4509_v20 = vld [vmem:[#allocation7 + $0x524] sm:$0xf]  ;;  %v4527_v26 = vld [vmem:[#allocation7 + $0x5b4] sm:$0xf] }
 0x1f7   :  { %v3728_v23 = vor.u32 %v4509_v20, %v3725_v22  ;;  %v3877_v20 = vld [vmem:[#allocation7 + $0x758] sm:$0xf0] }
 0x1fa   :  { %1649 = vmatpush.bf16.msrb.mxu3 %v3648_v42  ;;  %v3707_v42 = vld [vmem:[#allocation7 + $0x500] sm:$0xf] }
 0x252   :  { %v1068_v17 = vpop.f32.mrf.mxu0 }
 0x253   :  { %v1069_v34 = vadd.f32 %v1068_v17, %v895_v21  ;;  %v3643_v17 = vld [vmem:[#allocation7 + $0x680] sm:$0xf]  ;;  %v3764_v21 = vor.u32 %v4520_v7, %v3763_v6  ;;  %v4530_v7 = vld [vmem:[#allocation7 + $0x5c4] sm:$0xf0] }
 0x254   :  { %v3644_v31 = vor.u32 %v4554_v18, %v3643_v17  ;;  %v3803_v6 = vld [vmem:[#allocation7 + $0x5c0] sm:$0xf] }
 0x255   :  { %v3804_v15 = vor.u32 %v4530_v7, %v3803_v6  ;;  %v3723_v18 = vld [vmem:[#allocation7 + $0x520] sm:$0xf]  ;;  %v4581_v6 = vld [vmem:[#allocation7 + $0x764] sm:$0xf] }
 0x256   :  { %1623 = vmatpush.bf16.msrb.mxu1 %v3644_v31 }
 0x258   :  { %v1081_v37 = vpop.f32.mrf.mxu1  ;;  %v1094_v39 = vpop.f32.mrf.mxu2 }
 0x259   :  { %v1082_v43 = vadd.f32 %v1081_v37, %v1069_v34  ;;  %v1095_v56 = vadd.f32 %v1094_v39, %v896_v38  ;;  %v3829_v37 = vld [vmem:[#allocation7 + $0x5f8] sm:$0xf0]  ;;  %v3756_v38 = vor.u32 %v4518_v28, %v3755_v27  ;;  %v3819_v39 = vld [vmem:[#allocation7 + $0x5e0] sm:$0xf] }
 0x25a   :  { %v1070_v48 = vpop.f32.mrf.mxu0  ;;  %v3832_v45 = vor.u32 %v4535_v36, %v3829_v37  ;;  %v3797_v28 = vld [vmem:[#allocation7 + $0x5b8] sm:$0xf0]  ;;  %v3787_v36 = vld [vmem:[#allocation7 + $0x5a0] sm:$0xf]  ;;  %v4526_v37 = vld [vmem:[#allocation7 + $0x5a4] sm:$0xf0] }
 0x25b   :  { %vm1111_vm6 = vcmp.gt.f32.partialorder %v1082_v43, 0.0  ;;  %v1113_v53 = vmul.f32 0.01, %v1082_v43  ;;  %v3820_v48 = vor.u32 %v4534_v40, %v3819_v39  ;;  %v3800_v31 = vor.u32 %v4527_v26, %v3797_v28  ;;  %v3789_v40 = vld [vmem:[#allocation7 + $0x5a8] sm:$0xf0] }
 0x25c   :  { %v3788_v39 = vor.u32 %v4526_v37, %v3787_v36  ;;  %v4596_v36 = vld [vmem:[#allocation7 + $0x7d4] sm:$0xf0] }
 0x25d   :  { %v1115_v55 = vsel %vm1111_vm6, %v1082_v43, %v1113_v53  ;;  %v3747_v43 = vld [vmem:[#allocation7 + $0x550] sm:$0xf] }
 0x25e   :  { %v1117_v61 = vpack.c.bf16 %v1115_v55, %v1115_v55  ;;  %v1107_v62 = vpop.f32.mrf.mxu3  ;;  %v3748_v52 = vor.u32 %v4516_v44, %v3747_v43  ;;  %v3811_v53 = vld [vmem:[#allocation7 + $0x5d0] sm:$0xf]  ;;  %v3752_v55 = vor.u32 %v4515_v46, %v3749_v47  ;;  %v4506_v43 = vld [vmem:[#allocation7 + $0x504] sm:$0xf0]  ;;  %v3709_v46 = vld [vmem:[#allocation7 + $0x508] sm:$0xf0] }
 0x25f   :  { %v1108_v4 = vadd.f32 %v1107_v62, %v1095_v56  ;;  %v3739_v56 = vld [vmem:[#allocation7 + $0x540] sm:$0xf]  ;;  %v3812_v62 = vor.u32 %v4532_v54, %v3811_v53  ;;  %v3708_v44 = vor.u32 %v4506_v43, %v3707_v42  ;;  %v3941_v42 = vld [vmem:[#allocation7 + $0x7d8] sm:$0xf0] }
 0x260   :  { %v1083_v8 = vpop.f32.mrf.mxu1  ;;  %v1096_v9 = vpop.f32.mrf.mxu2  ;;  %1327 = vmatmul.bf16.vlgmr.msra.gmra.mxu0 %v1117_v61  ;;  %1353 = vmatmul.bf16.vlgmr.msra.gmra.mxu2 %v1117_v61  ;;  %v3741_v61 = vld [vmem:[#allocation7 + $0x548] sm:$0xf0]  ;;  %v3740_v1 = vor.u32 %v4514_v57, %v3739_v56  ;;  %v3771_v54 = vld [vmem:[#allocation7 + $0x580] sm:$0xf]  ;;  %v4521_v56 = vld [vmem:[#allocation7 + $0x584] sm:$0xf] }
 0x261   :  { %vm1112_vm7 = vcmp.gt.f32.partialorder %v1108_v4, 0.0  ;;  %v1114_v13 = vmul.f32 0.01, %v1108_v4  ;;  %1815 = vmatpush.bf16.msra.mxu0 %v3764_v21  ;;  %1841 = vmatpush.bf16.msra.mxu2 %v3768_v25  ;;  %v3816_v8 = vor.u32 %v4531_v63, %v3813_v0  ;;  %v4511_v9 = vld [vmem:[#allocation7 + $0x534] sm:$0xf] }
 0x262   :  { %v3736_v16 = vor.u32 %v4511_v9, %v3733_v10  ;;  %v4528_v25 = vld [vmem:[#allocation7 + $0x5b4] sm:$0xf0]  ;;  %v3893_v0 = vld [vmem:[#allocation7 + $0x778] sm:$0xf0]  ;;  %v3955_v9 = vld [vmem:[#allocation7 + $0x7f0] sm:$0xf] }
 0x263   :  { %v1116_v19 = vsel %vm1112_vm7, %v1108_v4, %v1114_v13  ;;  %v3744_v4 = vor.u32 %v4513_v60, %v3741_v61  ;;  %v3805_v13 = vld [vmem:[#allocation7 + $0x5c8] sm:$0xf0]  ;;  %v3891_v60 = vld [vmem:[#allocation7 + $0x770] sm:$0xf]  ;;  %v4584_v61 = vld [vmem:[#allocation7 + $0x774] sm:$0xf0] }
 0x264   :  { %v1118_v24 = vpack.c.bf16 %v1116_v19, %v1116_v19  ;;  %v3808_v17 = vor.u32 %v4529_v12, %v3805_v13  ;;  %v4510_v19 = vld [vmem:[#allocation7 + $0x524] sm:$0xf0]  ;;  %v3892_v63 = vor.u32 %v4584_v61, %v3891_v60  ;;  %v4600_v10 = vld [vmem:[#allocation7 + $0x7f4] sm:$0xf0]  ;;  %v4599_v13 = vld [vmem:[#allocation7 + $0x7f4] sm:$0xf] }
 0x265   :  { %1816 = vmatpush.bf16.msra.mxu0 %v3756_v38  ;;  %1842 = vmatpush.bf16.msra.mxu2 %v3760_v41  ;;  %v3724_v21 = vor.u32 %v4510_v19, %v3723_v18  ;;  %v4525_v38 = vld [vmem:[#allocation7 + $0x5a4] sm:$0xf]  ;;  %v3956_v12 = vor.u32 %v4600_v10, %v3955_v9  ;;  %v4580_v18 = vld [vmem:[#allocation7 + $0x754] sm:$0xf0]  ;;  %v4579_v19 = vld [vmem:[#allocation7 + $0x754] sm:$0xf] }
 0x266   :  { %v1109_v34 = vpop.f32.mrf.mxu3  ;;  %1340 = vmatmul.bf16.vlgmr.msra.gmra.mxu1 %v1118_v24  ;;  %1366 = vmatmul.bf16.vlgmr.msra.gmra.mxu3 %v1118_v24  ;;  %v3795_v24 = vld [vmem:[#allocation7 + $0x5b0] sm:$0xf]  ;;  %v3792_v41 = vor.u32 %v4525_v38, %v3789_v40  ;;  %v3880_v22 = vor.u32 %v4579_v19, %v3877_v20  ;;  %v4593_v9 = vld [vmem:[#allocation7 + $0x7c4] sm:$0xf]  ;;  %v4592_v20 = vld [vmem:[#allocation7 + $0x7b4] sm:$0xf0] }
 0x267   :  { %1828 = vmatpush.bf16.msra.mxu1 %v3828_v35  ;;  %1854 = vmatpush.bf16.msra.mxu3 %v3832_v45  ;;  %v3796_v27 = vor.u32 %v4528_v25, %v3795_v24  ;;  %v3717_v34 = vld [vmem:[#allocation7 + $0x518] sm:$0xf0]  ;;  %v4505_v45 = vld [vmem:[#allocation7 + $0x504] sm:$0xf]  ;;  %v4598_v24 = vld [vmem:[#allocation7 + $0x7e4] sm:$0xf0] }
 0x268   :  { %v3720_v35 = vor.u32 %v4507_v33, %v3717_v34  ;;  %v3712_v47 = vor.u32 %v4505_v45, %v3709_v46  ;;  %v4597_v25 = vld [vmem:[#allocation7 + $0x7e4] sm:$0xf]  ;;  %v3868_v33 = vor.u32 %v4578_v30, %v3867_v29  ;;  %v3869_v34 = vld [vmem:[#allocation7 + $0x748] sm:$0xf0]  ;;  %v3923_v19 = vld [vmem:[#allocation7 + $0x7b0] sm:$0xf] }
 0x269   :  { %1817 = vmatpush.bf16.msra.mxu0 %v3748_v52  ;;  %1843 = vmatpush.bf16.msra.mxu2 %v3752_v55  ;;  %v3781_v52 = vld [vmem:[#allocation7 + $0x598] sm:$0xf0]  ;;  %v4522_v55 = vld [vmem:[#allocation7 + $0x584] sm:$0xf0]  ;;  %v3915_v30 = vld [vmem:[#allocation7 + $0x7a0] sm:$0xf] }
 0x26a   :  { %v3784_v53 = vor.u32 %v4523_v50, %v3781_v52  ;;  %v3772_v57 = vor.u32 %v4522_v55, %v3771_v54  ;;  %v3845_v29 = vld [vmem:[#allocation7 + $0x718] sm:$0xf0] }
 0x26b   :  { %1829 = vmatpush.bf16.msra.mxu1 %v3820_v48  ;;  %1855 = vmatpush.bf16.msra.mxu3 %v3824_v58  ;;  %v3779_v48 = vld [vmem:[#allocation7 + $0x590] sm:$0xf]  ;;  %v3773_v58 = vld [vmem:[#allocation7 + $0x588] sm:$0xf0] }
 0x26c   :  { %v3780_v51 = vor.u32 %v4524_v49, %v3779_v48 }
 0x26d   :  { %1818 = vmatpush.bf16.msra.mxu0 %v3740_v1  ;;  %1844 = vmatpush.bf16.msra.mxu2 %v3744_v4  ;;  %v3883_v4 = vld [vmem:[#allocation7 + $0x760] sm:$0xf] }
 0x26e   :  { %v3884_v7 = vor.u32 %v4582_v5, %v3883_v4  ;;  %v3861_v5 = vld [vmem:[#allocation7 + $0x738] sm:$0xf0] }
 0x26f   :  { %1830 = vmatpush.bf16.msra.mxu1 %v3812_v62  ;;  %1856 = vmatpush.bf16.msra.mxu3 %v3816_v8  ;;  %v4583_v62 = vld [vmem:[#allocation7 + $0x774] sm:$0xf]  ;;  %v3885_v8 = vld [vmem:[#allocation7 + $0x768] sm:$0xf0] }
 0x270   :  { %1611 = vmatmul.bf16.vlgmr.msrb.gmra.mxu0 %v1408_v59  ;;  %1637 = vmatmul.bf16.vlgmr.msrb.gmra.mxu2 %v1408_v59  ;;  %v3776_v59 = vor.u32 %v4521_v56, %v3773_v58  ;;  %v3896_v1 = vor.u32 %v4583_v62, %v3893_v0 }
 0x271   :  { %1819 = vmatpush.bf16.msra.mxu0 %v3732_v14  ;;  %1845 = vmatpush.bf16.msra.mxu2 %v3736_v16  ;;  %v3957_v14 = vld [vmem:[#allocation7 + $0x7f8] sm:$0xf0] }
 0x273   :  { %1831 = vmatpush.bf16.msra.mxu1 %v3804_v15  ;;  %1857 = vmatpush.bf16.msra.mxu3 %v3808_v17  ;;  %v3875_v15 = vld [vmem:[#allocation7 + $0x750] sm:$0xf]  ;;  %v3960_v17 = vor.u32 %v4599_v13, %v3957_v14  ;;  %v4574_v13 = vld [vmem:[#allocation7 + $0x724] sm:$0xf0] }
 0x275   :  { %1820 = vmatpush.bf16.msra.mxu0 %v3724_v21  ;;  %1846 = vmatpush.bf16.msra.mxu2 %v3728_v23  ;;  %v3876_v21 = vor.u32 %v4580_v18, %v3875_v15  ;;  %v3947_v23 = vld [vmem:[#allocation7 + $0x7e0] sm:$0xf] }
 0x276   :  { %1650 = vmatmul.bf16.vlgmr.msrb.gmra.mxu3 %v1409_v11  ;;  %1624 = vmatmul.bf16.vlgmr.msrb.gmra.mxu1 %v1409_v11  ;;  %v3888_v11 = vor.u32 %v4581_v6, %v3885_v8  ;;  %v3948_v26 = vor.u32 %v4598_v24, %v3947_v23  ;;  %v4594_v8 = vld [vmem:[#allocation7 + $0x7c4] sm:$0xf0]  ;;  %v3925_v23 = vld [vmem:[#allocation7 + $0x7b8] sm:$0xf0] }
 0x277   :  { %1832 = vmatpush.bf16.msra.mxu1 %v3796_v27  ;;  %1858 = vmatpush.bf16.msra.mxu3 %v3800_v31  ;;  %v3949_v27 = vld [vmem:[#allocation7 + $0x7e8] sm:$0xf0]  ;;  %v4577_v31 = vld [vmem:[#allocation7 + $0x744] sm:$0xf] }
 0x278   :  { %v3952_v28 = vor.u32 %v4597_v25, %v3949_v27  ;;  %v3843_v25 = vld [vmem:[#allocation7 + $0x710] sm:$0xf]  ;;  %v4571_v27 = vld [vmem:[#allocation7 + $0x714] sm:$0xf] }
 0x279   :  { %1821 = vmatpush.bf16.msra.mxu0 %v3716_v32  ;;  %1847 = vmatpush.bf16.msra.mxu2 %v3720_v35  ;;  %v3939_v35 = vld [vmem:[#allocation7 + $0x7d0] sm:$0xf] }
 0x27a   :  { %v3940_v40 = vor.u32 %v4596_v36, %v3939_v35  ;;  %v3917_v35 = vld [vmem:[#allocation7 + $0x7a8] sm:$0xf0] }
 0x27b   :  { %1833 = vmatpush.bf16.msra.mxu1 %v3788_v39  ;;  %1859 = vmatpush.bf16.msra.mxu3 %v3792_v41  ;;  %v3872_v39 = vor.u32 %v4577_v31, %v3869_v34  ;;  %v4595_v41 = vld [vmem:[#allocation7 + $0x7d4] sm:$0xf]  ;;  %v4590_v31 = vld [vmem:[#allocation7 + $0x7a4] sm:$0xf0]  ;;  %v4589_v34 = vld [vmem:[#allocation7 + $0x7a4] sm:$0xf] }
 0x27c   :  { %v3944_v45 = vor.u32 %v4595_v41, %v3941_v42  ;;  %v3920_v36 = vor.u32 %v4589_v34, %v3917_v35  ;;  %v3837_v41 = vld [vmem:[#allocation7 + $0x708] sm:$0xf0] }
 0x27d   :  { %1822 = vmatpush.bf16.msra.mxu0 %v3708_v44  ;;  %1848 = vmatpush.bf16.msra.mxu2 %v3712_v47  ;;  %v1156_v44 = vperm.slane %v1153_v2, 1  ;;  %v4576_v2 = vld [vmem:[#allocation7 + $0x734] sm:$0xf0]  ;;  %v1868_v34 = vld [vmem:[#allocation8 + $0x5] ss:$8 sm:$0x3] }
 0x27f   :  { %1834 = vmatpush.bf16.msra.mxu1 %v3780_v51  ;;  %1860 = vmatpush.bf16.msra.mxu3 %v3784_v53 }
 0x281   :  { %2084 = vmatpush.bf16.msrb.mxu0 %v3892_v63  ;;  %2110 = vmatpush.bf16.msrb.mxu2 %v3896_v1  ;;  %v3859_v1 = vld [vmem:[#allocation7 + $0x730] sm:$0xf] }
 0x282   :  { %v3860_v4 = vor.u32 %v4576_v2, %v3859_v1  ;;  %v4613_v1 = vld [vmem:[#allocation7 + $0x864] sm:$0xf]  ;;  %v4013_v2 = vld [vmem:[#allocation7 + $0x868] sm:$0xf0] }
 0x283   :  { %1835 = vmatpush.bf16.msra.mxu1 %v3772_v57  ;;  %1861 = vmatpush.bf16.msra.mxu3 %v3776_v59 }
 0x285   :  { %2085 = vmatpush.bf16.msrb.mxu0 %v3884_v7  ;;  %2111 = vmatpush.bf16.msrb.mxu2 %v3888_v11  ;;  %v3931_v7 = vld [vmem:[#allocation7 + $0x7c0] sm:$0xf]  ;;  %v3933_v11 = vld [vmem:[#allocation7 + $0x7c8] sm:$0xf0] }
 0x286   :  { %v3932_v10 = vor.u32 %v4594_v8, %v3931_v7  ;;  %v3936_v14 = vor.u32 %v4593_v9, %v3933_v11  ;;  %v4085_v7 = vld [vmem:[#allocation7 + $0x8f8] sm:$0xf0]  ;;  %v4016_v8 = vor.u32 %v4613_v1, %v4013_v2  ;;  %v4003_v11 = vld [vmem:[#allocation7 + $0x850] sm:$0xf]  ;;  %v4059_v1 = vld [vmem:[#allocation7 + $0x8c0] sm:$0xf] }
 0x287   :  { %2097 = vmatpush.bf16.msrb.mxu1 %v3956_v12  ;;  %2123 = vmatpush.bf16.msrb.mxu3 %v3960_v17  ;;  %v3851_v12 = vld [vmem:[#allocation7 + $0x720] sm:$0xf]  ;;  %v3853_v17 = vld [vmem:[#allocation7 + $0x728] sm:$0xf0]  ;;  %v4626_v2 = vld [vmem:[#allocation7 + $0x8c4] sm:$0xf0] }
 0x288   :  { %v3852_v15 = vor.u32 %v4574_v13, %v3851_v12  ;;  %v4612_v12 = vld [vmem:[#allocation7 + $0x854] sm:$0xf0]  ;;  %v4611_v13 = vld [vmem:[#allocation7 + $0x854] sm:$0xf] }
 0x289   :  { %2086 = vmatpush.bf16.msrb.mxu0 %v3876_v21  ;;  %2112 = vmatpush.bf16.msrb.mxu2 %v3880_v22  ;;  %v4591_v21 = vld [vmem:[#allocation7 + $0x7b4] sm:$0xf]  ;;  %v3924_v22 = vor.u32 %v4592_v20, %v3923_v19  ;;  %v4077_v19 = vld [vmem:[#allocation7 + $0x8e8] sm:$0xf0]  ;;  %v4004_v20 = vor.u32 %v4612_v12, %v4003_v11  ;;  %v4051_v11 = vld [vmem:[#allocation7 + $0x8b0] sm:$0xf] }
 0x28a   :  { %v3928_v24 = vor.u32 %v4591_v21, %v3925_v23  ;;  %v4610_v23 = vld [vmem:[#allocation7 + $0x844] sm:$0xf0]  ;;  %v4624_v12 = vld [vmem:[#allocation7 + $0x8b4] sm:$0xf0] }
 0x28b   :  { %2098 = vmatpush.bf16.msrb.mxu1 %v3948_v26  ;;  %2124 = vmatpush.bf16.msrb.mxu3 %v3952_v28  ;;  %v4572_v26 = vld [vmem:[#allocation7 + $0x714] sm:$0xf0] }
 0x28c   :  { %v3844_v28 = vor.u32 %v4572_v26, %v3843_v25  ;;  %v4067_v25 = vld [vmem:[#allocation7 + $0x8d0] sm:$0xf]  ;;  %v4628_v26 = vld [vmem:[#allocation7 + $0x8d4] sm:$0xf0] }
 0x28d   :  { %2087 = vmatpush.bf16.msrb.mxu0 %v3868_v33  ;;  %2113 = vmatpush.bf16.msrb.mxu2 %v3872_v39  ;;  %v3916_v33 = vor.u32 %v4590_v31, %v3915_v30  ;;  %v4569_v39 = vld [vmem:[#allocation7 + $0x704] sm:$0xf]  ;;  %v4069_v30 = vld [vmem:[#allocation7 + $0x8d8] sm:$0xf0] }
 0x28e   :  { %v3840_v42 = vor.u32 %v4569_v39, %v3837_v41  ;;  %v4607_v39 = vld [vmem:[#allocation7 + $0x834] sm:$0xf] }
 0x28f   :  { %2099 = vmatpush.bf16.msrb.mxu1 %v3940_v40  ;;  %2125 = vmatpush.bf16.msrb.mxu3 %v3944_v45  ;;  %v4587_v45 = vld [vmem:[#allocation7 + $0x794] sm:$0xf] }
 0x291   :  { %2088 = vmatpush.bf16.msrb.mxu0 %v3860_v4 }
 0x293   :  { %2100 = vmatpush.bf16.msrb.mxu1 %v3932_v10  ;;  %2126 = vmatpush.bf16.msrb.mxu3 %v3936_v14  ;;  %v4005_v14 = vld [vmem:[#allocation7 + $0x858] sm:$0xf0] }
 0x295   :  { %2089 = vmatpush.bf16.msrb.mxu0 %v3852_v15  ;;  %v4075_v15 = vld [vmem:[#allocation7 + $0x8e0] sm:$0xf] }
 0x297   :  { %2101 = vmatpush.bf16.msrb.mxu1 %v3924_v22  ;;  %2127 = vmatpush.bf16.msrb.mxu3 %v3928_v24  ;;  %v3995_v22 = vld [vmem:[#allocation7 + $0x840] sm:$0xf]  ;;  %v4008_v24 = vor.u32 %v4611_v13, %v4005_v14  ;;  %v4052_v14 = vor.u32 %v4624_v12, %v4051_v11 }
 0x298   :  { %v3996_v35 = vor.u32 %v4610_v23, %v3995_v22  ;;  %v3973_v22 = vld [vmem:[#allocation7 + $0x818] sm:$0xf0] }
 0x299   :  { %2090 = vmatpush.bf16.msrb.mxu0 %v3844_v28  ;;  %v4609_v28 = vld [vmem:[#allocation7 + $0x844] sm:$0xf] }
 0x29b   :  { %2102 = vmatpush.bf16.msrb.mxu1 %v3916_v33  ;;  %2128 = vmatpush.bf16.msrb.mxu3 %v3920_v36 }
 0x2dd   :  { %v1328_v16 = vpop.f32.mrf.mxu0 }
 0x2de   :  { %v1329_v32 = vadd.f32 %v1328_v16, %v1155_v3  ;;  %v4575_v3 = vld [vmem:[#allocation7 + $0x734] sm:$0xf]  ;;  %v4573_v16 = vld [vmem:[#allocation7 + $0x724] sm:$0xf] }
 0x2df   :  { %v3864_v6 = vor.u32 %v4575_v3, %v3861_v5  ;;  %v3856_v18 = vor.u32 %v4573_v16, %v3853_v17  ;;  %v4083_v3 = vld [vmem:[#allocation7 + $0x8f0] sm:$0xf]  ;;  %v4632_v5 = vld [vmem:[#allocation7 + $0x8f4] sm:$0xf0]  ;;  %v4630_v16 = vld [vmem:[#allocation7 + $0x8e4] sm:$0xf0] }
 0x2e0   :  { %v4084_v9 = vor.u32 %v4632_v5, %v4083_v3  ;;  %v4076_v17 = vor.u32 %v4630_v16, %v4075_v15  ;;  %v4060_v3 = vor.u32 %v4626_v2, %v4059_v1  ;;  %v4623_v15 = vld [vmem:[#allocation7 + $0x8b4] sm:$0xf]  ;;  %v4053_v16 = vld [vmem:[#allocation7 + $0x8b8] sm:$0xf0] }
 0x2e1   :  { %2114 = vmatpush.bf16.msrb.mxu2 %v3864_v6  ;;  %v4631_v6 = vld [vmem:[#allocation7 + $0x8f4] sm:$0xf] }
 0x2e2   :  { %v4088_v10 = vor.u32 %v4631_v6, %v4085_v7  ;;  %v3979_v6 = vld [vmem:[#allocation7 + $0x820] sm:$0xf]  ;;  %v4606_v7 = vld [vmem:[#allocation7 + $0x824] sm:$0xf0] }
 0x2e3   :  { %v1341_v37 = vpop.f32.mrf.mxu1  ;;  %v1354_v38 = vpop.f32.mrf.mxu2 }
 0x2e4   :  { %v1342_v43 = vadd.f32 %v1341_v37, %v1329_v32  ;;  %v1355_v48 = vadd.f32 %v1354_v38, %v1156_v44  ;;  %v3848_v32 = vor.u32 %v4571_v27, %v3845_v29  ;;  %v3835_v37 = vld [vmem:[#allocation7 + $0x700] sm:$0xf]  ;;  %v4570_v38 = vld [vmem:[#allocation7 + $0x704] sm:$0xf0]  ;;  %v4588_v44 = vld [vmem:[#allocation7 + $0x794] sm:$0xf0] }
 0x2e5   :  { %v1330_v46 = vpop.f32.mrf.mxu0  ;;  %2115 = vmatpush.bf16.msrb.mxu2 %v3856_v18  ;;  %v3836_v40 = vor.u32 %v4570_v38, %v3835_v37  ;;  %v4629_v18 = vld [vmem:[#allocation7 + $0x8e4] sm:$0xf]  ;;  %v4627_v27 = vld [vmem:[#allocation7 + $0x8d4] sm:$0xf]  ;;  %v3997_v29 = vld [vmem:[#allocation7 + $0x848] sm:$0xf0] }
 0x2e6   :  { %v1373_v47 = vpack.c.bf16 %v1342_v43, %v1342_v43  ;;  %v3907_v43 = vld [vmem:[#allocation7 + $0x790] sm:$0xf]  ;;  %v4080_v21 = vor.u32 %v4629_v18, %v4077_v19  ;;  %v4072_v33 = vor.u32 %v4627_v27, %v4069_v30  ;;  %v4000_v36 = vor.u32 %v4609_v28, %v3997_v29  ;;  %v4608_v38 = vld [vmem:[#allocation7 + $0x834] sm:$0xf0]  ;;  %v4045_v28 = vld [vmem:[#allocation7 + $0x8a8] sm:$0xf0] }
 0x2e7   :  { %v3908_v46 = vor.u32 %v4588_v44, %v3907_v43  ;;  %2091 = vmatpush.bf16.msrb.mxu0 %v3836_v40  ;;  %v3987_v37 = vld [vmem:[#allocation7 + $0x830] sm:$0xf]  ;;  %v3989_v40 = vld [vmem:[#allocation7 + $0x838] sm:$0xf0]  ;;  %v4604_v19 = vld [vmem:[#allocation7 + $0x814] sm:$0xf0] }
 0x2e8   :  { %1823 = vmatmul.bf16.vlgmr.msra.gmra.mxu0 %v1373_v47  ;;  %1849 = vmatmul.bf16.vlgmr.msra.gmra.mxu2 %v1373_v47  ;;  %v3909_v47 = vld [vmem:[#allocation7 + $0x798] sm:$0xf0]  ;;  %v3988_v43 = vor.u32 %v4608_v38, %v3987_v37  ;;  %v3971_v18 = vld [vmem:[#allocation7 + $0x810] sm:$0xf]  ;;  %v3963_v30 = vld [vmem:[#allocation7 + $0x800] sm:$0xf] }
 0x2e9   :  { %v1367_v49 = vpop.f32.mrf.mxu3  ;;  %2116 = vmatpush.bf16.msrb.mxu2 %v3848_v32  ;;  %2103 = vmatpush.bf16.msrb.mxu1 %v3908_v46  ;;  %v4068_v32 = vor.u32 %v4628_v26, %v4067_v25  ;;  %v3992_v46 = vor.u32 %v4607_v39, %v3989_v40  ;;  %v4622_v25 = vld [vmem:[#allocation7 + $0x8a4] sm:$0xf0]  ;;  %v4621_v26 = vld [vmem:[#allocation7 + $0x8a4] sm:$0xf]  ;;  %v4620_v37 = vld [vmem:[#allocation7 + $0x894] sm:$0xf0] }
 0x2ea   :  { %v1368_v50 = vadd.f32 %v1367_v49, %v1355_v48  ;;  %v3912_v48 = vor.u32 %v4587_v45, %v3909_v47  ;;  %v3899_v49 = vld [vmem:[#allocation7 + $0x780] sm:$0xf]  ;;  %v4048_v29 = vor.u32 %v4621_v26, %v4045_v28  ;;  %v4619_v38 = vld [vmem:[#allocation7 + $0x894] sm:$0xf]  ;;  %v4037_v40 = vld [vmem:[#allocation7 + $0x898] sm:$0xf0] }
 0x2eb   :  { %v1343_v51 = vpop.f32.mrf.mxu1  ;;  %v1356_v52 = vpop.f32.mrf.mxu2  ;;  %v4115_v28 = vld [vmem:[#allocation7 + $0x930] sm:$0xf] }
 0x2ec   :  { %v1374_v53 = vpack.c.bf16 %v1368_v50, %v1368_v50  ;;  %2129 = vmatpush.bf16.msrb.mxu3 %v3912_v48  ;;  %v4586_v50 = vld [vmem:[#allocation7 + $0x784] sm:$0xf0]  ;;  %v4585_v51 = vld [vmem:[#allocation7 + $0x784] sm:$0xf] }
 0x2ed   :  { %v1612_v54 = vpop.f32.mrf.mxu0  ;;  %2117 = vmatpush.bf16.msrb.mxu2 %v3840_v42  ;;  %v3900_v52 = vor.u32 %v4586_v50, %v3899_v49  ;;  %v1870_v42 = vperm.slane %v1868_v34, 0 }
 0x2ee   :  { %1836 = vmatmul.bf16.vlgmr.msra.gmra.mxu1 %v1374_v53  ;;  %1862 = vmatmul.bf16.vlgmr.msra.gmra.mxu3 %v1374_v53  ;;  %v3901_v53 = vld [vmem:[#allocation7 + $0x788] sm:$0xf0] }
 0x2ef   :  { %2104 = vmatpush.bf16.msrb.mxu1 %v3900_v52  ;;  %v1871_v52 = vperm.slane %v1868_v34, 1  ;;  %v3965_v34 = vld [vmem:[#allocation7 + $0x808] sm:$0xf0] }
 0x2f1   :  { %v1369_v55 = vpop.f32.mrf.mxu3 }
 0x2f2   :  { %v4019_v55 = vld [vmem:[#allocation7 + $0x870] sm:$0xf] }
 0x2f3   :  { %v1625_v56 = vpop.f32.mrf.mxu1  ;;  %v1638_v58 = vpop.f32.mrf.mxu2  ;;  %2357 = vmatpush.bf16.msra.mxu1 %v4084_v9  ;;  %v3980_v9 = vor.u32 %v4606_v7, %v3979_v6  ;;  %v4203_v6 = vld [vmem:[#allocation7 + $0x9e0] sm:$0xf]  ;;  %v4662_v7 = vld [vmem:[#allocation7 + $0x9e4] sm:$0xf0] }
 0x2f4   :  { %v4884_v57 = vadd.f32 %v1625_v56, %v1612_v54  ;;  %v3904_v54 = vor.u32 %v4585_v51, %v3901_v53  ;;  %v4616_v56 = vld [vmem:[#allocation7 + $0x874] sm:$0xf0] }
 0x2f5   :  { %v1614_v59 = vpop.f32.mrf.mxu0 }
 0x2f6   :  { %2130 = vmatpush.bf16.msrb.mxu3 %v3904_v54  ;;  %v4020_v59 = vor.u32 %v4616_v56, %v4019_v55 }
 0x2f7   :  { %2358 = vmatpush.bf16.msra.mxu1 %v4076_v17  ;;  %v4056_v17 = vor.u32 %v4623_v15, %v4053_v16  ;;  %v4195_v16 = vld [vmem:[#allocation7 + $0x9d0] sm:$0xf] }
 0x2f8   :  { %2344 = vmatpush.bf16.msra.mxu0 %v4020_v59 }
 0x2f9   :  { %v1651_v60 = vpop.f32.mrf.mxu3 }
 0x2fa   :  { %v4886_v61 = vadd.f32 %v1651_v60, %v1638_v58  ;;  %v4615_v58 = vld [vmem:[#allocation7 + $0x874] sm:$0xf]  ;;  %v4021_v60 = vld [vmem:[#allocation7 + $0x878] sm:$0xf0]  ;;  %2383 = vmatpush.bf16.msra.mxu3 %v4088_v10  ;;  %v3981_v10 = vld [vmem:[#allocation7 + $0x828] sm:$0xf0] }
 0x2fb   :  { %v1627_v62 = vpop.f32.mrf.mxu1  ;;  %v1640_v63 = vpop.f32.mrf.mxu2  ;;  %2359 = vmatpush.bf16.msra.mxu1 %v4068_v32  ;;  %v4601_v32 = vld [vmem:[#allocation7 + $0x804] sm:$0xf] }
 0x2fc   :  { %v4011_v62 = vld [vmem:[#allocation7 + $0x860] sm:$0xf]  ;;  %v4614_v63 = vld [vmem:[#allocation7 + $0x864] sm:$0xf0] }
 0x2fd   :  { %v4012_v4 = vor.u32 %v4614_v63, %v4011_v62 }
 0x2fe   :  { %2384 = vmatpush.bf16.msra.mxu3 %v4080_v21  ;;  %v3972_v21 = vor.u32 %v4604_v19, %v3971_v18  ;;  %v4659_v18 = vld [vmem:[#allocation7 + $0x9d4] sm:$0xf]  ;;  %v4641_v19 = vld [vmem:[#allocation7 + $0x944] sm:$0xf] }
 0x2ff   :  { %2345 = vmatpush.bf16.msra.mxu0 %v4012_v4  ;;  %v4061_v4 = vld [vmem:[#allocation7 + $0x8c8] sm:$0xf0]  ;;  %2360 = vmatpush.bf16.msra.mxu1 %v4060_v3  ;;  %v4644_v3 = vld [vmem:[#allocation7 + $0x954] sm:$0xf0] }
 0x301   :  { %v1653_v0 = vpop.f32.mrf.mxu3 }
 0x302   :  { %v4024_v0 = vor.u32 %v4615_v58, %v4021_v60  ;;  %2385 = vmatpush.bf16.msra.mxu3 %v4072_v33 }
 0x303   :  { %2346 = vmatpush.bf16.msra.mxu0 %v4004_v20  ;;  %v4603_v20 = vld [vmem:[#allocation7 + $0x814] sm:$0xf]  ;;  %2361 = vmatpush.bf16.msra.mxu1 %v4052_v14  ;;  %v4642_v14 = vld [vmem:[#allocation7 + $0x944] sm:$0xf0] }
 0x304   :  { %2370 = vmatpush.bf16.msra.mxu2 %v4024_v0  ;;  %v3976_v23 = vor.u32 %v4603_v20, %v3973_v22  ;;  %v4125_v20 = vld [vmem:[#allocation7 + $0x948] sm:$0xf0] }
 0x305   :  { %v1918_v22 = vld [vmem:[#allocation8 + $0x6] ss:$8 sm:$0x3] }
 0x307   :  { %2347 = vmatpush.bf16.msra.mxu0 %v3996_v35  ;;  %v3968_v35 = vor.u32 %v4601_v32, %v3965_v34  ;;  %v4117_v32 = vld [vmem:[#allocation7 + $0x938] sm:$0xf0] }
 0x308   :  { %2371 = vmatpush.bf16.msra.mxu2 %v4016_v8  ;;  %v4605_v8 = vld [vmem:[#allocation7 + $0x824] sm:$0xf] }
 0x309   :  { %v3984_v13 = vor.u32 %v4605_v8, %v3981_v10  ;;  %v4204_v8 = vor.u32 %v4662_v7, %v4203_v6  ;;  %v4205_v10 = vld [vmem:[#allocation7 + $0x9e8] sm:$0xf0]  ;;  %v4099_v7 = vld [vmem:[#allocation7 + $0x910] sm:$0xf] }
 0x30b   :  { %2348 = vmatpush.bf16.msra.mxu0 %v3988_v43  ;;  %v4618_v43 = vld [vmem:[#allocation7 + $0x884] sm:$0xf0] }
 0x30c   :  { %2372 = vmatpush.bf16.msra.mxu2 %v4008_v24  ;;  %v4043_v24 = vld [vmem:[#allocation7 + $0x8a0] sm:$0xf] }
 0x30d   :  { %v4044_v27 = vor.u32 %v4622_v25, %v4043_v24 }
 0x30f   :  { %2349 = vmatpush.bf16.msra.mxu0 %v3980_v9  ;;  %2362 = vmatpush.bf16.msra.mxu1 %v4044_v27  ;;  %v4661_v9 = vld [vmem:[#allocation7 + $0x9e4] sm:$0xf]  ;;  %v4128_v27 = vor.u32 %v4641_v19, %v4125_v20  ;;  %v4091_v19 = vld [vmem:[#allocation7 + $0x900] sm:$0xf]  ;;  %v4634_v20 = vld [vmem:[#allocation7 + $0x904] sm:$0xf0] }
 0x310   :  { %2373 = vmatpush.bf16.msra.mxu2 %v4000_v36  ;;  %v4035_v36 = vld [vmem:[#allocation7 + $0x890] sm:$0xf]  ;;  %v4208_v12 = vor.u32 %v4661_v9, %v4205_v10  ;;  %v4635_v9 = vld [vmem:[#allocation7 + $0x914] sm:$0xf] }
 0x311   :  { %v4036_v39 = vor.u32 %v4620_v37, %v4035_v36 }
 0x313   :  { %2350 = vmatpush.bf16.msra.mxu0 %v3972_v21  ;;  %2363 = vmatpush.bf16.msra.mxu1 %v4036_v39  ;;  %v4197_v21 = vld [vmem:[#allocation7 + $0x9d8] sm:$0xf0]  ;;  %v1921_v39 = vperm.slane %v1918_v22, 1 }
 0x314   :  { %2374 = vmatpush.bf16.msra.mxu2 %v3992_v46  ;;  %v4029_v46 = vld [vmem:[#allocation7 + $0x888] sm:$0xf0]  ;;  %v4200_v24 = vor.u32 %v4659_v18, %v4197_v21  ;;  %v4633_v21 = vld [vmem:[#allocation7 + $0x904] sm:$0xf] }
 0x318   :  { %2375 = vmatpush.bf16.msra.mxu2 %v3984_v13  ;;  %v4123_v13 = vld [vmem:[#allocation7 + $0x940] sm:$0xf] }
 0x319   :  { %v4124_v25 = vor.u32 %v4642_v14, %v4123_v13  ;;  %v4171_v13 = vld [vmem:[#allocation7 + $0x9a0] sm:$0xf]  ;;  %v4654_v14 = vld [vmem:[#allocation7 + $0x9a4] sm:$0xf0] }
 0x31c   :  { %2376 = vmatpush.bf16.msra.mxu2 %v3976_v23 }
 0x320   :  { %2377 = vmatpush.bf16.msra.mxu2 %v3968_v35 }
 0x365   :  { %v1824_v31 = vpop.f32.mrf.mxu0 }
 0x366   :  { %v1825_v41 = vadd.f32 %v1824_v31, %v4884_v57  ;;  %v4602_v31 = vld [vmem:[#allocation7 + $0x804] sm:$0xf0] }
 0x367   :  { %v3964_v33 = vor.u32 %v4602_v31, %v3963_v30  ;;  %v1920_v30 = vperm.slane %v1918_v22, 0  ;;  %v4639_v31 = vld [vmem:[#allocation7 + $0x934] sm:$0xf]  ;;  %v4092_v22 = vor.u32 %v4634_v20, %v4091_v19 }
 0x368   :  { %v4120_v34 = vor.u32 %v4639_v31, %v4117_v32  ;;  %v4155_v31 = vld [vmem:[#allocation7 + $0x980] sm:$0xf]  ;;  %v4650_v32 = vld [vmem:[#allocation7 + $0x984] sm:$0xf0]  ;;  %v4671_v20 = vld [vmem:[#allocation7 + $0xa34] sm:$0xf] }
 0x369   :  { %2351 = vmatpush.bf16.msra.mxu0 %v3964_v33 }
 0x36b   :  { %v1837_v44 = vpop.f32.mrf.mxu1  ;;  %v1850_v45 = vpop.f32.mrf.mxu2 }
 0x36c   :  { %v1838_v47 = vadd.f32 %v1837_v44, %v1825_v41  ;;  %v1851_v51 = vadd.f32 %v1850_v45, %v4886_v61  ;;  %v4625_v61 = vld [vmem:[#allocation7 + $0x8c4] sm:$0xf]  ;;  %v4040_v41 = vor.u32 %v4619_v38, %v4037_v40 }
 0x36d   :  { %v1826_v48 = vpop.f32.mrf.mxu0  ;;  %v4064_v5 = vor.u32 %v4625_v61, %v4061_v4  ;;  %v4617_v44 = vld [vmem:[#allocation7 + $0x884] sm:$0xf]  ;;  %v4131_v61 = vld [vmem:[#allocation7 + $0x950] sm:$0xf]  ;;  %v4643_v4 = vld [vmem:[#allocation7 + $0x954] sm:$0xf] }
 0x36e   :  { %v1874_v49 = vadd.f32 %v1870_v42, %v1838_v47  ;;  %v4027_v42 = vld [vmem:[#allocation7 + $0x880] sm:$0xf]  ;;  %v4032_v47 = vor.u32 %v4617_v44, %v4029_v46  ;;  %v4147_v48 = vld [vmem:[#allocation7 + $0x970] sm:$0xf]  ;;  %v4132_v11 = vor.u32 %v4644_v3, %v4131_v61 }
 0x36f   :  { %2386 = vmatpush.bf16.msra.mxu3 %v4064_v5  ;;  %v4028_v45 = vor.u32 %v4618_v43, %v4027_v42  ;;  %v4133_v5 = vld [vmem:[#allocation7 + $0x958] sm:$0xf0] }
 0x370   :  { %vm1876_vm8 = vcmp.gt.f32.partialorder %v1874_v49, 0.0  ;;  %v1878_v50 = vmul.f32 0.01, %v1874_v49  ;;  %v4136_v15 = vor.u32 %v4643_v4, %v4133_v5  ;;  %v4655_v4 = vld [vmem:[#allocation7 + $0x9b4] sm:$0xf] }
 0x371   :  { %v1863_v53 = vpop.f32.mrf.mxu3  ;;  %2364 = vmatpush.bf16.msra.mxu1 %v4028_v45  ;;  %v4181_v5 = vld [vmem:[#allocation7 + $0x9b8] sm:$0xf0] }
 0x372   :  { %v1880_v54 = vsel %vm1876_vm8, %v1874_v49, %v1878_v50  ;;  %v1864_v57 = vadd.f32 %v1863_v53, %v1851_v51  ;;  %v4648_v49 = vld [vmem:[#allocation7 + $0x974] sm:$0xf0]  ;;  %v4647_v50 = vld [vmem:[#allocation7 + $0x974] sm:$0xf]  ;;  %v4139_v53 = vld [vmem:[#allocation7 + $0x960] sm:$0xf]  ;;  %v4184_v6 = vor.u32 %v4655_v4, %v4181_v5 }
 0x373   :  { %v1882_v55 = vpack.c.bf16 %v1880_v54, %v1880_v54  ;;  %v1839_v56 = vpop.f32.mrf.mxu1  ;;  %v1852_v58 = vpop.f32.mrf.mxu2  ;;  %2387 = vmatpush.bf16.msra.mxu3 %v4056_v17  ;;  %v4148_v51 = vor.u32 %v4648_v49, %v4147_v48  ;;  %v4646_v54 = vld [vmem:[#allocation7 + $0x964] sm:$0xf0]  ;;  %v4660_v17 = vld [vmem:[#allocation7 + $0x9d4] sm:$0xf0]  ;;  %v4323_v5 = vld [vmem:[#allocation7 + $0xad0] sm:$0xf] }
 0x374   :  { %v1875_v59 = vadd.f32 %v1871_v52, %v1864_v57  ;;  %v4149_v52 = vld [vmem:[#allocation7 + $0x978] sm:$0xf0]  ;;  %v4141_v56 = vld [vmem:[#allocation7 + $0x968] sm:$0xf0]  ;;  %v4211_v58 = vld [vmem:[#allocation7 + $0x9f0] sm:$0xf]  ;;  %v4196_v23 = vor.u32 %v4660_v17, %v4195_v16  ;;  %v4172_v16 = vor.u32 %v4654_v14, %v4171_v13 }
 0x375   :  { %2092 = vmatmul.bf16.vlgmr.msrb.gmra.mxu0 %v1882_v55  ;;  %2118 = vmatmul.bf16.vlgmr.msrb.gmra.mxu2 %v1882_v55  ;;  %v4152_v57 = vor.u32 %v4647_v50, %v4149_v52  ;;  %v4645_v55 = vld [vmem:[#allocation7 + $0x964] sm:$0xf]  ;;  %v4173_v17 = vld [vmem:[#allocation7 + $0x9a8] sm:$0xf0] }
 0x376   :  { %vm1877_vm9 = vcmp.gt.f32.partialorder %v1875_v59, 0.0  ;;  %v1879_v60 = vmul.f32 0.01, %v1875_v59  ;;  %2604 = vmatpush.bf16.msrb.mxu0 %v4148_v51 }
 0x377   :  { %2388 = vmatpush.bf16.msra.mxu3 %v4048_v29  ;;  %2630 = vmatpush.bf16.msrb.mxu2 %v4152_v57  ;;  %v4640_v29 = vld [vmem:[#allocation7 + $0x934] sm:$0xf0]  ;;  %v4657_v57 = vld [vmem:[#allocation7 + $0x9c4] sm:$0xf] }
 0x378   :  { %v1881_v62 = vsel %vm1877_vm9, %v1875_v59, %v1879_v60  ;;  %v4140_v59 = vor.u32 %v4646_v54, %v4139_v53  ;;  %v4664_v60 = vld [vmem:[#allocation7 + $0x9f4] sm:$0xf0]  ;;  %v4116_v33 = vor.u32 %v4640_v29, %v4115_v28  ;;  %v4187_v53 = vld [vmem:[#allocation7 + $0x9c0] sm:$0xf]  ;;  %v4658_v54 = vld [vmem:[#allocation7 + $0x9c4] sm:$0xf0] }
 0x379   :  { %v1883_v63 = vpack.c.bf16 %v1881_v62, %v1881_v62  ;;  %v1865_v0 = vpop.f32.mrf.mxu3  ;;  %v4663_v62 = vld [vmem:[#allocation7 + $0x9f4] sm:$0xf]  ;;  %v4212_v1 = vor.u32 %v4664_v60, %v4211_v58  ;;  %v4638_v60 = vld [vmem:[#allocation7 + $0x924] sm:$0xf0]  ;;  %v4165_v29 = vld [vmem:[#allocation7 + $0x998] sm:$0xf0] }
 0x37a   :  { %v4144_v0 = vor.u32 %v4645_v55, %v4141_v56  ;;  %2605 = vmatpush.bf16.msrb.mxu0 %v4140_v59  ;;  %v4188_v55 = vor.u32 %v4658_v54, %v4187_v53  ;;  %v4189_v56 = vld [vmem:[#allocation7 + $0x9c8] sm:$0xf0]  ;;  %v4107_v59 = vld [vmem:[#allocation7 + $0x920] sm:$0xf] }
 0x37b   :  { %2105 = vmatmul.bf16.vlgmr.msrb.gmra.mxu1 %v1883_v63  ;;  %2131 = vmatmul.bf16.vlgmr.msrb.gmra.mxu3 %v1883_v63  ;;  %v4213_v63 = vld [vmem:[#allocation7 + $0x9f8] sm:$0xf0]  ;;  %v4192_v58 = vor.u32 %v4657_v57, %v4189_v56  ;;  %v4259_v57 = vld [vmem:[#allocation7 + $0xa50] sm:$0xf]  ;;  %v4675_v56 = vld [vmem:[#allocation7 + $0xa54] sm:$0xf] }
 0x37c   :  { %2389 = vmatpush.bf16.msra.mxu3 %v4040_v41  ;;  %v4216_v2 = vor.u32 %v4663_v62, %v4213_v63  ;;  %2617 = vmatpush.bf16.msrb.mxu1 %v4212_v1  ;;  %v4637_v62 = vld [vmem:[#allocation7 + $0x924] sm:$0xf]  ;;  %v4108_v63 = vor.u32 %v4638_v60, %v4107_v59  ;;  %v4179_v1 = vld [vmem:[#allocation7 + $0x9b0] sm:$0xf]  ;;  %v4331_v59 = vld [vmem:[#allocation7 + $0xae0] sm:$0xf] }
 0x37d   :  { %2631 = vmatpush.bf16.msrb.mxu2 %v4144_v0  ;;  %v4109_v0 = vld [vmem:[#allocation7 + $0x928] sm:$0xf0]  ;;  %v4694_v60 = vld [vmem:[#allocation7 + $0xae4] sm:$0xf0] }
 0x37e   :  { %2606 = vmatpush.bf16.msrb.mxu0 %v4132_v11  ;;  %v4112_v61 = vor.u32 %v4637_v62, %v4109_v0  ;;  %v4101_v11 = vld [vmem:[#allocation7 + $0x918] sm:$0xf0]  ;;  %v4332_v62 = vor.u32 %v4694_v60, %v4331_v59  ;;  %v4333_v0 = vld [vmem:[#allocation7 + $0xae8] sm:$0xf0]  ;;  %v4227_v60 = vld [vmem:[#allocation7 + $0xa10] sm:$0xf] }
 0x380   :  { %2390 = vmatpush.bf16.msra.mxu3 %v4032_v47  ;;  %2618 = vmatpush.bf16.msrb.mxu1 %v4204_v8  ;;  %v4636_v8 = vld [vmem:[#allocation7 + $0x914] sm:$0xf0] }
 0x381   :  { %2632 = vmatpush.bf16.msrb.mxu2 %v4136_v15  ;;  %v4100_v10 = vor.u32 %v4636_v8, %v4099_v7  ;;  %v4653_v15 = vld [vmem:[#allocation7 + $0x9a4] sm:$0xf]  ;;  %v4691_v7 = vld [vmem:[#allocation7 + $0xad4] sm:$0xf] }
 0x382   :  { %2607 = vmatpush.bf16.msrb.mxu0 %v4124_v25  ;;  %v4176_v18 = vor.u32 %v4653_v15, %v4173_v17  ;;  %v4163_v25 = vld [vmem:[#allocation7 + $0x990] sm:$0xf]  ;;  %v4673_v8 = vld [vmem:[#allocation7 + $0xa44] sm:$0xf] }
 0x383   :  { %v4243_v17 = vld [vmem:[#allocation7 + $0xa30] sm:$0xf] }
 0x384   :  { %2643 = vmatpush.bf16.msrb.mxu3 %v4216_v2  ;;  %2619 = vmatpush.bf16.msrb.mxu1 %v4196_v23  ;;  %v4656_v2 = vld [vmem:[#allocation7 + $0x9b4] sm:$0xf0]  ;;  %v4093_v23 = vld [vmem:[#allocation7 + $0x908] sm:$0xf0] }
 0x385   :  { %2633 = vmatpush.bf16.msrb.mxu2 %v4128_v27  ;;  %v4180_v3 = vor.u32 %v4656_v2, %v4179_v1  ;;  %v4651_v27 = vld [vmem:[#allocation7 + $0x994] sm:$0xf] }
 0x386   :  { %2608 = vmatpush.bf16.msrb.mxu0 %v4116_v33  ;;  %v4649_v33 = vld [vmem:[#allocation7 + $0x984] sm:$0xf] }
 0x388   :  { %2644 = vmatpush.bf16.msrb.mxu3 %v4208_v12  ;;  %2620 = vmatpush.bf16.msrb.mxu1 %v4188_v55  ;;  %v4104_v12 = vor.u32 %v4635_v9, %v4101_v11  ;;  %v4676_v55 = vld [vmem:[#allocation7 + $0xa54] sm:$0xf0]  ;;  %v4253_v9 = vld [vmem:[#allocation7 + $0xa48] sm:$0xf0] }
 0x389   :  { %2634 = vmatpush.bf16.msrb.mxu2 %v4120_v34  ;;  %v4156_v34 = vor.u32 %v4650_v32, %v4155_v31  ;;  %v4260_v1 = vor.u32 %v4676_v55, %v4259_v57  ;;  %v2178_v11 = vld [vmem:[#allocation8 + $0x7] ss:$8 sm:$0x3] }
 0x38a   :  { %2609 = vmatpush.bf16.msrb.mxu0 %v4108_v63  ;;  %v4693_v63 = vld [vmem:[#allocation7 + $0xae4] sm:$0xf]  ;;  %v2180_v19 = vperm.slane %v2178_v11, 0 }
 0x38b   :  { %v4336_v2 = vor.u32 %v4693_v63, %v4333_v0  ;;  %v4667_v63 = vld [vmem:[#allocation7 + $0xa14] sm:$0xf] }
 0x38c   :  { %2645 = vmatpush.bf16.msrb.mxu3 %v4200_v24  ;;  %2621 = vmatpush.bf16.msrb.mxu1 %v4180_v3  ;;  %v4096_v24 = vor.u32 %v4633_v21, %v4093_v23  ;;  %v4674_v3 = vld [vmem:[#allocation7 + $0xa44] sm:$0xf0]  ;;  %v4245_v21 = vld [vmem:[#allocation7 + $0xa38] sm:$0xf0] }
 0x38d   :  { %2635 = vmatpush.bf16.msrb.mxu2 %v4112_v61  ;;  %v4251_v61 = vld [vmem:[#allocation7 + $0xa40] sm:$0xf]  ;;  %v4248_v23 = vor.u32 %v4671_v20, %v4245_v21  ;;  %v4682_v21 = vld [vmem:[#allocation7 + $0xa84] sm:$0xf0] }
 0x38e   :  { %2610 = vmatpush.bf16.msrb.mxu0 %v4100_v10  ;;  %v4325_v10 = vld [vmem:[#allocation7 + $0xad8] sm:$0xf0]  ;;  %v4252_v14 = vor.u32 %v4674_v3, %v4251_v61  ;;  %v4299_v61 = vld [vmem:[#allocation7 + $0xaa0] sm:$0xf]  ;;  %v4686_v3 = vld [vmem:[#allocation7 + $0xaa4] sm:$0xf0] }
 0x38f   :  { %v4328_v13 = vor.u32 %v4691_v7, %v4325_v10  ;;  %v4665_v10 = vld [vmem:[#allocation7 + $0xa04] sm:$0xf]  ;;  %v4283_v20 = vld [vmem:[#allocation7 + $0xa80] sm:$0xf] }
 0x390   :  { %2646 = vmatpush.bf16.msrb.mxu3 %v4192_v58  ;;  %2622 = vmatpush.bf16.msrb.mxu1 %v4172_v16  ;;  %v4261_v58 = vld [vmem:[#allocation7 + $0xa58] sm:$0xf0]  ;;  %v4256_v16 = vor.u32 %v4673_v8, %v4253_v9  ;;  %v4219_v8 = vld [vmem:[#allocation7 + $0xa00] sm:$0xf]  ;;  %v4666_v9 = vld [vmem:[#allocation7 + $0xa04] sm:$0xf0] }
 0x391   :  { %2636 = vmatpush.bf16.msrb.mxu2 %v4104_v12  ;;  %v4264_v4 = vor.u32 %v4675_v56, %v4261_v58  ;;  %v4687_v56 = vld [vmem:[#allocation7 + $0xab4] sm:$0xf]  ;;  %v4309_v58 = vld [vmem:[#allocation7 + $0xab8] sm:$0xf0] }
 0x392   :  { %2611 = vmatpush.bf16.msrb.mxu0 %v4092_v22  ;;  %v4312_v59 = vor.u32 %v4687_v56, %v4309_v58 }
 0x394   :  { %2647 = vmatpush.bf16.msrb.mxu3 %v4184_v6  ;;  %v4692_v6 = vld [vmem:[#allocation7 + $0xad4] sm:$0xf0] }
 0x395   :  { %2637 = vmatpush.bf16.msrb.mxu2 %v4096_v24  ;;  %v4324_v12 = vor.u32 %v4692_v6, %v4323_v5  ;;  %v4300_v5 = vor.u32 %v4686_v3, %v4299_v61  ;;  %v4301_v6 = vld [vmem:[#allocation7 + $0xaa8] sm:$0xf0] }
 0x398   :  { %2648 = vmatpush.bf16.msrb.mxu3 %v4176_v18  ;;  %v4672_v18 = vld [vmem:[#allocation7 + $0xa34] sm:$0xf0] }
 0x399   :  { %v4244_v22 = vor.u32 %v4672_v18, %v4243_v17  ;;  %v4293_v18 = vld [vmem:[#allocation7 + $0xa98] sm:$0xf0] }
 0x3f2   :  { %v2093_v26 = vpop.f32.mrf.mxu0 }
 0x3f3   :  { %v2094_v35 = vadd.f32 %v2093_v26, %v1920_v30  ;;  %v4652_v26 = vld [vmem:[#allocation7 + $0x994] sm:$0xf0]  ;;  %v4168_v30 = vor.u32 %v4651_v27, %v4165_v29 }
 0x3f4   :  { %v4164_v28 = vor.u32 %v4652_v26, %v4163_v25 }
 0x3f5   :  { %2649 = vmatpush.bf16.msrb.mxu3 %v4168_v30 }
 0x3f6   :  { %2623 = vmatpush.bf16.msrb.mxu1 %v4164_v28  ;;  %v2181_v28 = vperm.slane %v2178_v11, 1  ;;  %v4220_v11 = vor.u32 %v4666_v9, %v4219_v8 }
 0x3f8   :  { %v2106_v36 = vpop.f32.mrf.mxu1  ;;  %v2119_v37 = vpop.f32.mrf.mxu2 }
 0x3f9   :  { %v2107_v38 = vadd.f32 %v2106_v36, %v2094_v35  ;;  %v2120_v43 = vadd.f32 %v2119_v37, %v1921_v39  ;;  %v4157_v35 = vld [vmem:[#allocation7 + $0x988] sm:$0xf0]  ;;  %v4275_v37 = vld [vmem:[#allocation7 + $0xa70] sm:$0xf]  ;;  %v4679_v39 = vld [vmem:[#allocation7 + $0xa74] sm:$0xf] }
 0x3fa   :  { %v2095_v40 = vpop.f32.mrf.mxu0  ;;  %v4160_v36 = vor.u32 %v4649_v33, %v4157_v35  ;;  %2624 = vmatpush.bf16.msrb.mxu1 %v4156_v34 }
 0x3fb   :  { %vm2136_vm10 = vcmp.gt.f32.partialorder %v2107_v38, 0.0  ;;  %v2138_v41 = vmul.f32 0.01, %v2107_v38 }
 0x3fc   :  { %2650 = vmatpush.bf16.msrb.mxu3 %v4160_v36 }
 0x3fd   :  { %v2140_v42 = vsel %vm2136_vm10, %v2107_v38, %v2138_v41  ;;  %v4680_v38 = vld [vmem:[#allocation7 + $0xa74] sm:$0xf0]  ;;  %v4277_v41 = vld [vmem:[#allocation7 + $0xa78] sm:$0xf0] }
 0x3fe   :  { %v2142_v44 = vpack.c.bf16 %v2140_v42, %v2140_v42  ;;  %v2132_v45 = vpop.f32.mrf.mxu3  ;;  %v4276_v40 = vor.u32 %v4680_v38, %v4275_v37  ;;  %v4267_v42 = vld [vmem:[#allocation7 + $0xa60] sm:$0xf] }
 0x3ff   :  { %v2133_v46 = vadd.f32 %v2132_v45, %v2120_v43  ;;  %v4678_v43 = vld [vmem:[#allocation7 + $0xa64] sm:$0xf0]  ;;  %v4677_v45 = vld [vmem:[#allocation7 + $0xa64] sm:$0xf] }
 0x400   :  { %v2108_v47 = vpop.f32.mrf.mxu1  ;;  %v2121_v48 = vpop.f32.mrf.mxu2  ;;  %2352 = vmatmul.bf16.vlgmr.msra.gmra.mxu0 %v2142_v44  ;;  %2378 = vmatmul.bf16.vlgmr.msra.gmra.mxu2 %v2142_v44  ;;  %v4280_v44 = vor.u32 %v4679_v39, %v4277_v41 }
 0x401   :  { %vm2137_vm11 = vcmp.gt.f32.partialorder %v2133_v46, 0.0  ;;  %v2139_v49 = vmul.f32 0.01, %v2133_v46  ;;  %v4339_v47 = vld [vmem:[#allocation7 + $0xaf0] sm:$0xf]  ;;  %2864 = vmatpush.bf16.msra.mxu0 %v4276_v40  ;;  %v4268_v48 = vor.u32 %v4678_v43, %v4267_v42 }
 0x402   :  { %2890 = vmatpush.bf16.msra.mxu2 %v4280_v44  ;;  %v4315_v42 = vld [vmem:[#allocation7 + $0xac0] sm:$0xf]  ;;  %v4690_v43 = vld [vmem:[#allocation7 + $0xac4] sm:$0xf0]  ;;  %v4689_v44 = vld [vmem:[#allocation7 + $0xac4] sm:$0xf] }
 0x403   :  { %v2141_v50 = vsel %vm2137_vm11, %v2133_v46, %v2139_v49  ;;  %v4269_v46 = vld [vmem:[#allocation7 + $0xa68] sm:$0xf0]  ;;  %v4696_v49 = vld [vmem:[#allocation7 + $0xaf4] sm:$0xf0] }
 0x404   :  { %v2143_v51 = vpack.c.bf16 %v2141_v50, %v2141_v50  ;;  %v4695_v50 = vld [vmem:[#allocation7 + $0xaf4] sm:$0xf]  ;;  %v4340_v53 = vor.u32 %v4696_v49, %v4339_v47  ;;  %v4670_v49 = vld [vmem:[#allocation7 + $0xa24] sm:$0xf0] }
 0x405   :  { %2865 = vmatpush.bf16.msra.mxu0 %v4268_v48  ;;  %v4235_v48 = vld [vmem:[#allocation7 + $0xa20] sm:$0xf] }
 0x406   :  { %v2134_v52 = vpop.f32.mrf.mxu3  ;;  %2365 = vmatmul.bf16.vlgmr.msra.gmra.mxu1 %v2143_v51  ;;  %2391 = vmatmul.bf16.vlgmr.msra.gmra.mxu3 %v2143_v51  ;;  %v4341_v51 = vld [vmem:[#allocation7 + $0xaf8] sm:$0xf0] }
 0x407   :  { %v4272_v52 = vor.u32 %v4677_v45, %v4269_v46  ;;  %v4344_v54 = vor.u32 %v4695_v50, %v4341_v51  ;;  %2877 = vmatpush.bf16.msra.mxu1 %v4340_v53  ;;  %v4316_v45 = vor.u32 %v4690_v43, %v4315_v42  ;;  %v4317_v46 = vld [vmem:[#allocation7 + $0xac8] sm:$0xf0]  ;;  %v4669_v50 = vld [vmem:[#allocation7 + $0xa24] sm:$0xf]  ;;  %v4236_v51 = vor.u32 %v4670_v49, %v4235_v48  ;;  %v4307_v53 = vld [vmem:[#allocation7 + $0xab0] sm:$0xf] }
 0x408   :  { %v4320_v47 = vor.u32 %v4689_v44, %v4317_v46 }
 0x409   :  { %2903 = vmatpush.bf16.msra.mxu3 %v4344_v54  ;;  %2891 = vmatpush.bf16.msra.mxu2 %v4272_v52  ;;  %v4237_v52 = vld [vmem:[#allocation7 + $0xa28] sm:$0xf0]  ;;  %v4688_v54 = vld [vmem:[#allocation7 + $0xab4] sm:$0xf0] }
 0x40a   :  { %2866 = vmatpush.bf16.msra.mxu0 %v4260_v1  ;;  %v4240_v57 = vor.u32 %v4669_v50, %v4237_v52  ;;  %v4308_v55 = vor.u32 %v4688_v54, %v4307_v53  ;;  %v4229_v1 = vld [vmem:[#allocation7 + $0xa18] sm:$0xf0] }
 0x40b   :  { %2878 = vmatpush.bf16.msra.mxu1 %v4332_v62  ;;  %v4668_v62 = vld [vmem:[#allocation7 + $0xa14] sm:$0xf0] }
 0x40c   :  { %v4228_v0 = vor.u32 %v4668_v62, %v4227_v60 }
 0x40d   :  { %2904 = vmatpush.bf16.msra.mxu3 %v4336_v2  ;;  %2892 = vmatpush.bf16.msra.mxu2 %v4264_v4  ;;  %v4232_v2 = vor.u32 %v4667_v63, %v4229_v1  ;;  %v4685_v4 = vld [vmem:[#allocation7 + $0xaa4] sm:$0xf] }
 0x40e   :  { %2867 = vmatpush.bf16.msra.mxu0 %v4252_v14  ;;  %v4304_v7 = vor.u32 %v4685_v4, %v4301_v6  ;;  %v4291_v14 = vld [vmem:[#allocation7 + $0xa90] sm:$0xf] }
 0x40f   :  { %2879 = vmatpush.bf16.msra.mxu1 %v4324_v12  ;;  %v4221_v12 = vld [vmem:[#allocation7 + $0xa08] sm:$0xf0] }
 0x411   :  { %2905 = vmatpush.bf16.msra.mxu3 %v4328_v13  ;;  %2893 = vmatpush.bf16.msra.mxu2 %v4256_v16  ;;  %v4224_v13 = vor.u32 %v4665_v10, %v4221_v12  ;;  %v4683_v16 = vld [vmem:[#allocation7 + $0xa94] sm:$0xf] }
 0x412   :  { %2868 = vmatpush.bf16.msra.mxu0 %v4244_v22  ;;  %v4681_v22 = vld [vmem:[#allocation7 + $0xa84] sm:$0xf] }
 0x413   :  { %2880 = vmatpush.bf16.msra.mxu1 %v4316_v45 }
 0x415   :  { %2894 = vmatpush.bf16.msra.mxu2 %v4248_v23  ;;  %2906 = vmatpush.bf16.msra.mxu3 %v4320_v47  ;;  %v4284_v23 = vor.u32 %v4682_v21, %v4283_v20  ;;  %v2698_v47 = vld [vmem:[#allocation8 + $0x11] ss:$8 sm:$0x3] }
 0x416   :  { %2869 = vmatpush.bf16.msra.mxu0 %v4236_v51  ;;  %v2700_v49 = vperm.slane %v2698_v47, 0  ;;  %v2701_v54 = vperm.slane %v2698_v47, 1 }
 0x417   :  { %2881 = vmatpush.bf16.msra.mxu1 %v4308_v55 }
 0x419   :  { %2895 = vmatpush.bf16.msra.mxu2 %v4240_v57  ;;  %2907 = vmatpush.bf16.msra.mxu3 %v4312_v59 }
 0x41a   :  { %2870 = vmatpush.bf16.msra.mxu0 %v4228_v0 }
 0x41b   :  { %2882 = vmatpush.bf16.msra.mxu1 %v4300_v5 }
 0x41d   :  { %2896 = vmatpush.bf16.msra.mxu2 %v4232_v2  ;;  %2908 = vmatpush.bf16.msra.mxu3 %v4304_v7 }
 0x41e   :  { %2871 = vmatpush.bf16.msra.mxu0 %v4220_v11 }
 0x421   :  { %2897 = vmatpush.bf16.msra.mxu2 %v4224_v13 }
 0x47d   :  { %v2353_v15 = vpop.f32.mrf.mxu0 }
 0x47e   :  { %v2354_v24 = vadd.f32 %v2353_v15, %v2180_v19  ;;  %v4684_v15 = vld [vmem:[#allocation7 + $0xa94] sm:$0xf0]  ;;  %v4296_v19 = vor.u32 %v4683_v16, %v4293_v18 }
 0x47f   :  { %v4292_v17 = vor.u32 %v4684_v15, %v4291_v14 }
 0x480   :  { %2909 = vmatpush.bf16.msra.mxu3 %v4296_v19 }
 0x481   :  { %2883 = vmatpush.bf16.msra.mxu1 %v4292_v17 }
 0x483   :  { %v2366_v25 = vpop.f32.mrf.mxu1  ;;  %v2379_v26 = vpop.f32.mrf.mxu2 }
 0x484   :  { %v2367_v27 = vadd.f32 %v2366_v25, %v2354_v24  ;;  %v2380_v32 = vadd.f32 %v2379_v26, %v2181_v28  ;;  %v4285_v24 = vld [vmem:[#allocation7 + $0xa88] sm:$0xf0]  ;;  %v2438_v26 = vld [vmem:[#allocation8 + $0x10] ss:$8 sm:$0x3] }
 0x485   :  { %v2355_v29 = vpop.f32.mrf.mxu0  ;;  %v4288_v25 = vor.u32 %v4681_v22, %v4285_v24  ;;  %2884 = vmatpush.bf16.msra.mxu1 %v4284_v23  ;;  %v2440_v28 = vperm.slane %v2438_v26, 0 }
 0x486   :  { %vm2396_vm12 = vcmp.gt.f32.partialorder %v2367_v27, 0.0  ;;  %v2398_v30 = vmul.f32 0.01, %v2367_v27 }
 0x487   :  { %2910 = vmatpush.bf16.msra.mxu3 %v4288_v25 }
 0x488   :  { %v2400_v31 = vsel %vm2396_vm12, %v2367_v27, %v2398_v30 }
 0x489   :  { %v2402_v33 = vpack.c.bf16 %v2400_v31, %v2400_v31  ;;  %v2392_v34 = vpop.f32.mrf.mxu3 }
 0x48a   :  { %v2393_v35 = vadd.f32 %v2392_v34, %v2380_v32 }
 0x48b   :  { %v2368_v36 = vpop.f32.mrf.mxu1  ;;  %v2381_v37 = vpop.f32.mrf.mxu2  ;;  %2612 = vmatmul.bf16.vlgmr.msrb.gmra.mxu0 %v2402_v33  ;;  %2638 = vmatmul.bf16.vlgmr.msrb.gmra.mxu2 %v2402_v33  ;;  %v2441_v33 = vperm.slane %v2438_v26, 1 }
 0x48c   :  { %vm2397_vm13 = vcmp.gt.f32.partialorder %v2393_v35, 0.0  ;;  %v2399_v38 = vmul.f32 0.01, %v2393_v35 }
 0x48e   :  { %v2401_v39 = vsel %vm2397_vm13, %v2393_v35, %v2399_v38 }
 0x48f   :  { %v2403_v40 = vpack.c.bf16 %v2401_v39, %v2401_v39 }
 0x491   :  { %v2394_v41 = vpop.f32.mrf.mxu3  ;;  %2625 = vmatmul.bf16.vlgmr.msrb.gmra.mxu1 %v2403_v40  ;;  %2651 = vmatmul.bf16.vlgmr.msrb.gmra.mxu3 %v2403_v40 }
 0x508   :  { %v2613_v27 = vpop.f32.mrf.mxu0 }
 0x509   :  { %v2614_v29 = vadd.f32 %v2613_v27, %v2440_v28 }
 0x50e   :  { %v2626_v30 = vpop.f32.mrf.mxu1  ;;  %v2639_v31 = vpop.f32.mrf.mxu2 }
 0x50f   :  { %v2627_v32 = vadd.f32 %v2626_v30, %v2614_v29  ;;  %v2640_v37 = vadd.f32 %v2639_v31, %v2441_v33 }
 0x510   :  { %v2615_v34 = vpop.f32.mrf.mxu0 }
 0x511   :  { %vm2656_vm14 = vcmp.gt.f32.partialorder %v2627_v32, 0.0  ;;  %v2658_v35 = vmul.f32 0.01, %v2627_v32 }
 0x513   :  { %v2660_v36 = vsel %vm2656_vm14, %v2627_v32, %v2658_v35 }
 0x514   :  { %v2662_v38 = vpack.c.bf16 %v2660_v36, %v2660_v36  ;;  %v2652_v39 = vpop.f32.mrf.mxu3 }
 0x515   :  { %v2653_v40 = vadd.f32 %v2652_v39, %v2640_v37 }
 0x516   :  { %v2628_v41 = vpop.f32.mrf.mxu1  ;;  %v2641_v42 = vpop.f32.mrf.mxu2  ;;  %2872 = vmatmul.bf16.vlgmr.msra.gmra.mxu0 %v2662_v38  ;;  %2898 = vmatmul.bf16.vlgmr.msra.gmra.mxu2 %v2662_v38 }
 0x517   :  { %vm2657_vm15 = vcmp.gt.f32.partialorder %v2653_v40, 0.0  ;;  %v2659_v43 = vmul.f32 0.01, %v2653_v40 }
 0x519   :  { %v2661_v44 = vsel %vm2657_vm15, %v2653_v40, %v2659_v43 }
 0x51a   :  { %v2663_v45 = vpack.c.bf16 %v2661_v44, %v2661_v44 }
 0x51c   :  { %v2654_v46 = vpop.f32.mrf.mxu3  ;;  %2885 = vmatmul.bf16.vlgmr.msra.gmra.mxu1 %v2663_v45  ;;  %2911 = vmatmul.bf16.vlgmr.msra.gmra.mxu3 %v2663_v45 }
 0x593   :  { %v2873_v48 = vpop.f32.mrf.mxu0 }
 0x594   :  { %v2874_v50 = vadd.f32 %v2873_v48, %v2700_v49 }
 0x599   :  { %v2886_v51 = vpop.f32.mrf.mxu1  ;;  %v2899_v52 = vpop.f32.mrf.mxu2 }
 0x59a   :  { %v2887_v53 = vadd.f32 %v2886_v51, %v2874_v50  ;;  %v2900_v55 = vadd.f32 %v2899_v52, %v2701_v54 }
 0x59b   :  { %v2875_v57 = vpop.f32.mrf.mxu0 }
 0x59c   :  { %2916 = vst [vmem:[#allocation10] sm:$0xff] %v2887_v53 }
 0x59f   :  { %v2912_v56 = vpop.f32.mrf.mxu3 }
 0x5a0   :  { %v2913_v58 = vadd.f32 %v2912_v56, %v2900_v55 }
 0x5a1   :  { %v2888_v59 = vpop.f32.mrf.mxu1  ;;  %v2901_v60 = vpop.f32.mrf.mxu2 }
 0x5a2   :  { %2917 = vst [vmem:[#allocation10 + $0x8] sm:$0xff] %v2913_v58 }
 0x5a3   :  { %2928 = dma.vmem_to_hbm [thread:$0]  %s2924_s3, 256, %s2926_s13, [#allocation4]  }
 0x5a7   :  { %v2914_v62 = vpop.f32.mrf.mxu3 }
 0x5a8   :  { %4832 = dma.done.wait [#allocation4], 256  }
 0x5a9   :  { %4833 = vsyncadd [#allocation4], 4294967040 }
 0x5aa   :  { %2933 = vsyncpa [#allocation3], 1 }
 0x5ab   :  { %2934 = vsyncpa [#allocation6], 1 }
 0x5ac   :  { %2935 = vsyncpa [#allocation9], 1 }
 0x5ad   :  { %2936 = vsyncpa [#allocation4], 1 }

</bundles_post_ra>
